<compile_context>
chip_gen: v7x
topology: tpu7x:2x2x1
jax: 0.10.0
libtpu: 0.0.40
codegen_flags: <defaults>
</compile_context>

<pallas_src>
import math

import jax
import jax.numpy as jnp
from jax.experimental import pallas as pl
from jax.experimental.pallas import tpu as pltpu

VMEM_SPEC = pl.BlockSpec(memory_space=pltpu.MemorySpace.VMEM)
HBM_SPEC = pl.BlockSpec(memory_space=pl.ANY)

D_S2 = 768        # BERT pooled dim
D_H = 200         # SessionGraph global-hidden dim
D_H_PAD = 256     # padded K for the H_global part (multiple of 128)
D_LIN_IN = D_S2 + D_H_PAD   # 1024
D_OUT = 768       # nn.Linear(200 + 768, 768) output
GCN_IN = 256
GCN_OUT = 256


# ----------------------------------------------------------------------------
# Fused kernel: GraphConvolution + concat-linear, one launch, two outputs.
# lin_w stays in HBM (pl.ANY); its DMA into a VMEM scratch is started first and
# overlaps the two GCN matmuls, then awaited just before the big linear.
# ----------------------------------------------------------------------------
def _fused_kernel(x_ref, adj_ref, gcn_w_ref, gcn_b_ref,
                  act_ref, lin_w_hbm, lin_b_ref,
                  gcn_out_ref, s2_out_ref,
                  lin_w_vmem, dma_sem):
    # Kick off the dominant (1.5 MiB bf16) weight DMA so it hides behind the GCN.
    lin_w_cp = pltpu.make_async_copy(lin_w_hbm, lin_w_vmem, dma_sem)
    lin_w_cp.start()

    # ---- GraphConvolution: out = adj @ (x @ W) + b  (bf16 operands, f32 accum) ----
    support = jnp.dot(x_ref[...], gcn_w_ref[...],
                      preferred_element_type=jnp.float32)
    gcn = jnp.dot(adj_ref[...], support.astype(jnp.bfloat16),
                  preferred_element_type=jnp.float32)
    gcn_out_ref[...] = gcn + gcn_b_ref[...]

    # ---- self.linear(cat([s2, H_global_R], 1)) as ONE matmul over the
    #      pre-concatenated (B, 1024) bf16 activation (zero-padded tail cols
    #      match the zero-padded tail rows of lin_w).
    lin_w_cp.wait()
    s2_out_ref[...] = (
        jnp.dot(act_ref[...], lin_w_vmem[...], preferred_element_type=jnp.float32)
        + lin_b_ref[...]
    )


# ----------------------------------------------------------------------------
# Parameter init (mirrors the PyTorch __init__ shapes / init ranges).
# Weights stored bf16; lin_w is [768 + 256, 768] with zero rows 968:1024.
# ----------------------------------------------------------------------------
def init_params(key):
    k_gcn_w, k_gcn_b, k_lin_w, k_lin_b = jax.random.split(key, 4)

    # GraphConvolution(256, 256): uniform(-1/sqrt(out_f), 1/sqrt(out_f))
    stdv = 1.0 / math.sqrt(GCN_OUT)
    gcn_w = jax.random.uniform(k_gcn_w, (GCN_IN, GCN_OUT), jnp.float32, -stdv, stdv)
    gcn_b = jax.random.uniform(k_gcn_b, (GCN_OUT,), jnp.float32, -stdv, stdv)

    # nn.Linear(200 + 768, 768): stored as [in, out] (= PyTorch weight.T)
    lin_in = D_S2 + D_H
    bound = 1.0 / math.sqrt(lin_in)
    lin_w = jax.random.uniform(k_lin_w, (lin_in, D_OUT), jnp.float32, -bound, bound)
    lin_b = jax.random.uniform(k_lin_b, (D_OUT,), jnp.float32, -bound, bound)

    # Pad the H_global block's K from 200 -> 256 with zero rows (done ONCE here,
    # so the forward never re-slices / re-pads the weight in HBM).
    lin_w_padded = jnp.zeros((D_LIN_IN, D_OUT), jnp.float32)
    lin_w_padded = lin_w_padded.at[:D_S2].set(lin_w[:D_S2])
    lin_w_padded = lin_w_padded.at[D_S2:D_S2 + D_H].set(lin_w[D_S2:])

    return {
        "gcn_w": gcn_w.astype(jnp.bfloat16),
        "gcn_b": gcn_b.reshape(1, -1),                 # f32 bias (broadcast over rows)
        "lin_w": lin_w_padded.astype(jnp.bfloat16),
        "lin_b": lin_b.reshape(1, -1),
    }


# ----------------------------------------------------------------------------
# Forward (jitted; single fused pallas_call, no wrapper pads / output slices).
# ----------------------------------------------------------------------------
@jax.jit
def gpjfnnf_forward(params, s1_vec, s2_bert_vec, h_global_r, gcn_x, gcn_adj):
    b = s2_bert_vec.shape[0]
    n = gcn_x.shape[0]

    # One fused concat + zero-pad + bf16 cast -> (B, 1024) activation.
    act = jnp.concatenate(
        [s2_bert_vec, h_global_r,
         jnp.zeros((b, D_H_PAD - D_H), s2_bert_vec.dtype)],
        axis=1,
    ).astype(jnp.bfloat16)
    x_bf = gcn_x.astype(jnp.bfloat16)
    adj_bf = gcn_adj.astype(jnp.bfloat16)

    flops = (2 * n * GCN_IN * GCN_OUT          # x @ W
             + 2 * n * n * GCN_OUT             # adj @ support
             + 2 * b * D_LIN_IN * D_OUT)       # concat-linear
    bytes_accessed = (
        n * GCN_IN * 2 + n * n * 2 + GCN_IN * GCN_OUT * 2 + GCN_OUT * 4
        + b * D_LIN_IN * 2 + D_LIN_IN * D_OUT * 2 + D_OUT * 4
        + n * GCN_OUT * 4 + b * D_OUT * 4
    )

    gcn_out, s2_out = pl.pallas_call(
        _fused_kernel,
        out_shape=(
            jax.ShapeDtypeStruct((n, GCN_OUT), jnp.float32),
            jax.ShapeDtypeStruct((b, D_OUT), jnp.float32),
        ),
        in_specs=[VMEM_SPEC,   # x
                  VMEM_SPEC,   # adj
                  VMEM_SPEC,   # gcn_w
                  VMEM_SPEC,   # gcn_b
                  VMEM_SPEC,   # act (concatenated s2 | H_global | zeros)
                  HBM_SPEC,    # lin_w stays in HBM; DMA'd manually in-kernel
                  VMEM_SPEC],  # lin_b
        out_specs=(VMEM_SPEC, VMEM_SPEC),
        scratch_shapes=[
            pltpu.VMEM((D_LIN_IN, D_OUT), jnp.bfloat16),   # lin_w landing buffer
            pltpu.SemaphoreType.DMA(()),
        ],
        cost_estimate=pl.CostEstimate(
            flops=flops, transcendentals=0, bytes_accessed=bytes_accessed),
    )(x_bf, adj_bf, params["gcn_w"], params["gcn_b"],
      act, params["lin_w"], params["lin_b"])

    # s1_vec is the BERT pooled output for sentence 1 (passed through unchanged).
    return s1_vec, s2_out, gcn_out


if __name__ == "__main__":
    key = jax.random.PRNGKey(0)
    k_params, k_s1, k_s2, k_h, k_x, k_adj = jax.random.split(key, 6)

    params = init_params(k_params)

    B = 2   # batch
    N = 8   # graph nodes for the GCN demo
    s1_vec = jax.random.normal(k_s1, (B, D_S2), jnp.float32)       # BERT pooled (s1)
    s2_bert_vec = jax.random.normal(k_s2, (B, D_S2), jnp.float32)  # BERT pooled (s2)
    h_global_r = jax.random.normal(k_h, (B, D_H), jnp.float32)     # SessionGraph global hidden
    gcn_x = jax.random.normal(k_x, (N, GCN_IN), jnp.float32)       # node features
    gcn_adj = jax.random.uniform(k_adj, (N, N), jnp.float32)       # dense adjacency

    s1_out, s2_out, gcn_out = gpjfnnf_forward(
        params, s1_vec, s2_bert_vec, h_global_r, gcn_x, gcn_adj
    )
    jax.block_until_ready((s1_out, s2_out, gcn_out))

    # Reference check at matching precision (bf16 operands, f32 accumulation).
    ref_support = jnp.dot(gcn_x.astype(jnp.bfloat16), params["gcn_w"],
                          preferred_element_type=jnp.float32)
    ref_gcn = jnp.dot(gcn_adj.astype(jnp.bfloat16), ref_support.astype(jnp.bfloat16),
                      preferred_element_type=jnp.float32) + params["gcn_b"]
    act_ref = jnp.concatenate(
        [s2_bert_vec, h_global_r, jnp.zeros((B, D_H_PAD - D_H), jnp.float32)],
        axis=1).astype(jnp.bfloat16)
    ref_s2 = (jnp.dot(act_ref, params["lin_w"], preferred_element_type=jnp.float32)
              + params["lin_b"])

    assert jnp.allclose(gcn_out, ref_gcn, atol=1e-2, rtol=1e-2)
    assert jnp.allclose(s2_out, ref_s2, atol=1e-2, rtol=1e-2)
    assert s1_out.shape == (B, D_S2) and s2_out.shape == (B, D_OUT)
    assert gcn_out.shape == (N, GCN_OUT)

    print("KERNEL_OK")
</pallas_src>

<mosaic_0001>
module attributes {stable_mosaic.version = 11 : i64} {
  func.func @_fused_kernel(%arg0: memref<8x256xbf16, #tpu.memory_space<vmem>>, %arg1: memref<8x8xbf16, #tpu.memory_space<vmem>>, %arg2: memref<256x256xbf16, #tpu.memory_space<vmem>>, %arg3: memref<1x256xf32, #tpu.memory_space<vmem>>, %arg4: memref<2x1024xbf16, #tpu.memory_space<vmem>>, %arg5: memref<1024x768xbf16, #tpu.memory_space<any>>, %arg6: memref<1x768xf32, #tpu.memory_space<vmem>>, %arg7: memref<8x256xf32, #tpu.memory_space<vmem>>, %arg8: memref<2x768xf32, #tpu.memory_space<vmem>>, %arg9: memref<1024x768xbf16, #tpu.memory_space<vmem>>, %arg10: memref<!tpu.dma_semaphore, #tpu.memory_space<semaphore_mem>>) attributes {dimension_semantics = [], scalar_prefetch = 0 : i64, scratch_operands = 2 : i64, tpu.core_type = #tpu.core_type<tc>} {
    tpu.enqueue_dma source(%arg5 : memref<1024x768xbf16, #tpu.memory_space<any>>) target(%arg9 : memref<1024x768xbf16, #tpu.memory_space<vmem>>) target_semaphore(%arg10 : memref<!tpu.dma_semaphore, #tpu.memory_space<semaphore_mem>>)
    %c0 = arith.constant 0 : index
    %c0_0 = arith.constant 0 : index
    %0 = vector.load %arg0[%c0, %c0_0] : memref<8x256xbf16, #tpu.memory_space<vmem>>, vector<8x256xbf16>
    %c0_1 = arith.constant 0 : index
    %c0_2 = arith.constant 0 : index
    %1 = vector.load %arg2[%c0_1, %c0_2] : memref<256x256xbf16, #tpu.memory_space<vmem>>, vector<256x256xbf16>
    %cst = arith.constant dense<0.000000e+00> : vector<8x256xf32>
    %2 = tpu.matmul %0, %1, %cst {dimension_numbers = #tpu.dot_dimension_numbers<[1], [0], [0], [1], [0, 0, 1, 1], [], []>} : vector<8x256xbf16>, vector<256x256xbf16>, vector<8x256xf32> -> vector<8x256xf32>
    %c0_3 = arith.constant 0 : index
    %c0_4 = arith.constant 0 : index
    %3 = vector.load %arg1[%c0_3, %c0_4] : memref<8x8xbf16, #tpu.memory_space<vmem>>, vector<8x8xbf16>
    %4 = arith.truncf %2 : vector<8x256xf32> to vector<8x256xbf16>
    %cst_5 = arith.constant dense<0.000000e+00> : vector<8x256xf32>
    %5 = tpu.matmul %3, %4, %cst_5 {dimension_numbers = #tpu.dot_dimension_numbers<[1], [0], [0], [1], [0, 0, 1, 1], [], []>} : vector<8x8xbf16>, vector<8x256xbf16>, vector<8x256xf32> -> vector<8x256xf32>
    %c0_6 = arith.constant 0 : index
    %c0_7 = arith.constant 0 : index
    %6 = vector.load %arg3[%c0_6, %c0_7] : memref<1x256xf32, #tpu.memory_space<vmem>>, vector<1x256xf32>
    %7 = vector.broadcast %6 : vector<1x256xf32> to vector<8x256xf32>
    %8 = arith.addf %5, %7 : vector<8x256xf32>
    %c0_8 = arith.constant 0 : index
    %c0_9 = arith.constant 0 : index
    %9 = vector.load %arg7[%c0_8, %c0_9] : memref<8x256xf32, #tpu.memory_space<vmem>>, vector<8x256xf32>
    tpu.vector_store %arg7[%c0_8, %c0_9], %8 {strides = array<i32>} : memref<8x256xf32, #tpu.memory_space<vmem>>, vector<8x256xf32>,
    tpu.wait_dma2 semaphore(%arg10 : memref<!tpu.dma_semaphore, #tpu.memory_space<semaphore_mem>>) src(%arg5 : memref<1024x768xbf16, #tpu.memory_space<any>>) dst(%arg9 : memref<1024x768xbf16, #tpu.memory_space<vmem>>)
    %c0_10 = arith.constant 0 : index
    %c0_11 = arith.constant 0 : index
    %10 = vector.load %arg4[%c0_10, %c0_11] : memref<2x1024xbf16, #tpu.memory_space<vmem>>, vector<2x1024xbf16>
    %c0_12 = arith.constant 0 : index
    %c0_13 = arith.constant 0 : index
    %11 = vector.load %arg9[%c0_12, %c0_13] : memref<1024x768xbf16, #tpu.memory_space<vmem>>, vector<1024x768xbf16>
    %cst_14 = arith.constant dense<0.000000e+00> : vector<2x768xf32>
    %12 = tpu.matmul %10, %11, %cst_14 {dimension_numbers = #tpu.dot_dimension_numbers<[1], [0], [0], [1], [0, 0, 1, 1], [], []>} : vector<2x1024xbf16>, vector<1024x768xbf16>, vector<2x768xf32> -> vector<2x768xf32>
    %c0_15 = arith.constant 0 : index
    %c0_16 = arith.constant 0 : index
    %13 = vector.load %arg6[%c0_15, %c0_16] : memref<1x768xf32, #tpu.memory_space<vmem>>, vector<1x768xf32>
    %14 = vector.broadcast %13 : vector<1x768xf32> to vector<2x768xf32>
    %15 = arith.addf %12, %14 : vector<2x768xf32>
    %c0_17 = arith.constant 0 : index
    %c0_18 = arith.constant 0 : index
    %16 = vector.load %arg8[%c0_17, %c0_18] : memref<2x768xf32, #tpu.memory_space<vmem>>, vector<2x768xf32>
    tpu.vector_store %arg8[%c0_17, %c0_18], %15 {strides = array<i32>} : memref<2x768xf32, #tpu.memory_space<vmem>>, vector<2x768xf32>,
    return
  }
}

</mosaic_0001>

<bundles_post_ra>
// kernel: gpjfnnf_forward.1
= control target key start
LH: loop header
LB: loop body
LE: loop exit
PB: predicated region body
PF: predicated region fallthrough
CT: control target
= control target key end

     0   :  { %14 = vsyncpa [#allocation5], 0  ;;  %s1973_s0 = inlined_call_operand.vmem [shape: bf16[8,256], index: 0, kind: input, shape index: {}]   ;;  %s1974_s1 = inlined_call_operand.vmem [shape: bf16[8,8], index: 1, kind: input, shape index: {}]   ;;  %s1975_s2 = inlined_call_operand.hbm [shape: bf16[256,256], index: 2, kind: input, shape index: {}]   ;;  %s1976_s3 = inlined_call_operand.hbm [shape: f32[1,256], index: 3, kind: input, shape index: {}]   ;;  %s1977_s4 = inlined_call_operand.vmem [shape: bf16[2,1024], index: 4, kind: input, shape index: {}]   ;;  %s1978_s5 = inlined_call_operand.hbm [shape: bf16[1024,768], index: 5, kind: input, shape index: {}]   ;;  %s1979_s6 = inlined_call_operand.hbm [shape: f32[1,768], index: 6, kind: input, shape index: {}]   ;;  %s1980_s7 = inlined_call_operand.hbm [shape: f32[8,256], index: 7, kind: output, shape index: {0}]   ;;  %s1981_s8 = inlined_call_operand.hbm [shape: f32[2,768], index: 8, kind: output, shape index: {1}]  }
   0x1   :  { %15 = vsyncpa [#allocation8], 0 }
   0x2   :  { %16 = vsyncpa [#allocation6], 0 }
   0x3   :  { %17 = vsyncpa [#allocation12], 0  ;;  %s1723_s27 = smov [#allocation7]   ;;  %s1724_s29 = smov [#allocation4]  }
   0x4   :  { %s40_s28 = sshll.u32 %s1723_s27, 4  ;;  %s27_s30 = sshll.u32 %s1724_s29, 4  ;;  %s41_s28 = int_to_ptr.vmem [resolvable:$true] %s40_s28  ;;  %s1787_s30 = int_to_ptr.vmem [resolvable:$true] %s27_s30 }
   0x5   :  { %s1603_s11 = scalar_lea.hbm %s1976_s3, 32 }
   0x6   :  { %p1604_p0 = scmp.ne.s32.totalorder %s1976_s3, %s1603_s11  ;;  %p1607_p1 = scmp.lt.u32.totalorder %s1603_s11, %s1976_s3 }
   0x8   :  { %p1609_p2 = pnand %p1607_p1, %p1604_p0 }
   0xa   :  { %1612 = shalt.err (!%p1609_p2)
}
   0xb   :  { %s1613_s16 = scalar_lea.vmem %s41_s28, 32  ;;  %p1618_p4 = scmp.lt.s32.totalorder %s41_s28, %s41_s28 }
   0xc   :  { %p1614_p3 = scmp.ne.s32.totalorder %s41_s28, %s1613_s16  ;;  %p1619_p5 = scmp.lt.s32.totalorder %s1613_s16, %s1613_s16 }
   0xe   :  { %p1620_p6 = por %p1619_p5, %p1618_p4 }
  0x10   :  { %p1621_p7 = pnand %p1620_p6, %p1614_p3 }
  0x12   :  { %1624 = shalt.err (!%p1621_p7)
}
  0x13   :  { %43 = dma.hbm_to_vmem [thread:$0]  %s1976_s3, 32, %s41_s28, [#allocation8]  }
  0x14   :  { %s1625_s21 = scalar_lea.hbm %s1975_s2, 4096 }
  0x15   :  { %p1626_p8 = scmp.ne.s32.totalorder %s1975_s2, %s1625_s21  ;;  %p1629_p9 = scmp.lt.u32.totalorder %s1625_s21, %s1975_s2 }
  0x17   :  { %p1631_p10 = pnand %p1629_p9, %p1626_p8 }
  0x19   :  { %1634 = shalt.err (!%p1631_p10)
}
  0x1a   :  { %s1635_s26 = scalar_lea.vmem %s1787_s30, 4096  ;;  %p1640_p12 = scmp.lt.s32.totalorder %s1787_s30, %s1787_s30 }
  0x1b   :  { %p1636_p11 = scmp.ne.s32.totalorder %s1787_s30, %s1635_s26  ;;  %p1641_p13 = scmp.lt.s32.totalorder %s1635_s26, %s1635_s26 }
  0x1d   :  { %p1642_p0 = por %p1641_p13, %p1640_p12 }
  0x1f   :  { %p1643_p1 = pnand %p1642_p0, %p1636_p11 }
  0x21   :  { %1646 = shalt.err (!%p1643_p1)
}
  0x22   :  { %s1725_s3 = smov 128   ;;  %s1726_s27 = smov 8  }
  0x23   :  { %33 = dma.hbm_to_vmem [thread:$0]  %s1975_s2, 4096, %s1787_s30, [#allocation5], %s1725_s3, %s1725_s3, %s1726_s27  }
  0x24   :  { %s1727_s9 = smov [#allocation9]   ;;  %s1647_s13 = scalar_lea.hbm %s1979_s6, 96 }
  0x25   :  { %s52_s10 = sshll.u32 %s1727_s9, 4  ;;  %p1648_p2 = scmp.ne.s32.totalorder %s1979_s6, %s1647_s13  ;;  %s53_s10 = int_to_ptr.vmem [resolvable:$true] %s52_s10 }
  0x26   :  { %p1651_p3 = scmp.lt.u32.totalorder %s1647_s13, %s1979_s6 }
  0x28   :  { %p1653_p4 = pnand %p1651_p3, %p1648_p2 }
  0x2a   :  { %1656 = shalt.err (!%p1653_p4)
}
  0x2b   :  { %s1657_s18 = scalar_lea.vmem %s53_s10, 96  ;;  %p1662_p6 = scmp.lt.s32.totalorder %s53_s10, %s53_s10 }
  0x2c   :  { %p1658_p5 = scmp.ne.s32.totalorder %s53_s10, %s1657_s18  ;;  %p1663_p7 = scmp.lt.s32.totalorder %s1657_s18, %s1657_s18 }
  0x2e   :  { %p1664_p8 = por %p1663_p7, %p1662_p6 }
  0x30   :  { %p1665_p9 = pnand %p1664_p8, %p1658_p5 }
  0x32   :  { %1668 = shalt.err (!%p1665_p9)
}
  0x33   :  { %55 = dma.hbm_to_vmem [thread:$0]  %s1979_s6, 96, %s53_s10, [#allocation8]  }
  0x34   :  { %1713 = dma.done.wait [#allocation5], 4096  }
  0x35   :  { %1714 = vsyncadd [#allocation5], 4294963200 }
  0x36   :  { %1715 = dma.done.wait [#allocation8], 128  }
  0x37   :  { %1716 = vsyncadd [#allocation8], 4294967168  ;;  %s70_s19 = sld [smem:[#allocation0]]   ;;  %s1728_s20 = smov 768   ;;  %v1737_v35 = vmov 0   ;;  %vm361_vm0 = vcmask 1043456   ;;  %v347_v44 = vlaneseq }
  0x38   :  { %82 = sst [smem:[#allocation14]] %s1728_s20  ;;  %s1729_s21 = smov 6   ;;  %vm357_vm1 = vcmask 64512  }
  0x39   :  { %84 = sst [smem:[#allocation14 + $0x1]] %s1728_s20  ;;  %s1730_s22 = smov 64   ;;  %v1842_v45 = vshrl.u32 %v347_v44, 7 }
  0x3a   :  { %86 = sst [smem:[#allocation14 + $0x2]] %s1729_s21  ;;  %s1731_s23 = smov 2  }
  0x3b   :  { %88 = sst [smem:[#allocation14 + $0x3]] %s1730_s22  ;;  %s1732_s25 = smov 384   ;;  %v349_v46 = vsub.s32 0, %v1842_v45  ;;  %v353_v48 = vsub.s32 1, %v1842_v45 }
  0x3c   :  { %90 = sst [smem:[#allocation14 + $0x4]] %s1725_s3  ;;  %s1733_s26 = smov 4  }
  0x3d   :  { %92 = sst [smem:[#allocation14 + $0x5]] %s1731_s23  ;;  %s1453_s24 = sshll.u32 %s70_s19, 26 }
  0x3e   :  { %94 = sst [smem:[#allocation14 + $0x6]] %s1732_s25  ;;  %s1454_s6 = sadd.s32 134217728, %s1453_s24 }
  0x3f   :  { %96 = sst [smem:[#allocation14 + $0x7]] %s1730_s22  ;;  %s1734_s27 = smov [#allocation2]  }
  0x40   :  { %98 = sst [smem:[#allocation14 + $0x8]] %s1733_s26  ;;  %s78_s28 = sshll.u32 %s1734_s27, 4  ;;  %s79_s28 = int_to_ptr.vmem [resolvable:$true] %s78_s28 }
  0x41   :  { %s1735_s29 = smov [#allocation3]   ;;  %s1736_s9 = smov [#allocation13]  }
  0x42   :  { %100 = dma.general %s1978_s5, 49152, %s79_s28, %s1735_s29, %s1736_s9, [#allocation14], %s1454_s6, 0  }
  0x43   :  { %v1552_v0 = vld [vmem:[#allocation4 + $0x4] ss:$8 sps:$4 sm:$0xff]   ;;  %v1554_v1 = vld [vmem:[#allocation4] ss:$8 sps:$4 sm:$0xff]   ;;  %v1555_v2 = vld [vmem:[#allocation4 + $0x14] ss:$8 sps:$4 sm:$0xff]  }
  0x44   :  { %301 = vmatprep.subr.bf16.mxu0 %v1552_v0  ;;  %v1557_v3 = vld [vmem:[#allocation4 + $0x10] ss:$8 sps:$4 sm:$0xff]   ;;  %v1558_v4 = vld [vmem:[#allocation4 + $0x24] ss:$8 sps:$4 sm:$0xff]   ;;  %v1560_v5 = vld [vmem:[#allocation4 + $0x20] ss:$8 sps:$4 sm:$0xff]  }
  0x45   :  { %302 = vmatpush1.bf16.msra.mxu0 %v1554_v1  ;;  %v1561_v6 = vld [vmem:[#allocation4 + $0x34] ss:$8 sps:$4 sm:$0xff]   ;;  %v1563_v7 = vld [vmem:[#allocation4 + $0x30] ss:$8 sps:$4 sm:$0xff]   ;;  %v1564_v8 = vld [vmem:[#allocation4 + $0x44] ss:$8 sps:$4 sm:$0xff]  }
  0x46   :  { %303 = vmatprep.subr.bf16.mxu0 %v1555_v2  ;;  %v1566_v9 = vld [vmem:[#allocation4 + $0x40] ss:$8 sps:$4 sm:$0xff]   ;;  %v1567_v10 = vld [vmem:[#allocation4 + $0x54] ss:$8 sps:$4 sm:$0xff]   ;;  %v1569_v11 = vld [vmem:[#allocation4 + $0x50] ss:$8 sps:$4 sm:$0xff]  }
  0x47   :  { %v1570_v12 = vld [vmem:[#allocation4 + $0x64] ss:$8 sps:$4 sm:$0xff]   ;;  %v1572_v15 = vld [vmem:[#allocation4 + $0x60] ss:$8 sps:$4 sm:$0xff]   ;;  %v1573_v16 = vld [vmem:[#allocation4 + $0x74] ss:$8 sps:$4 sm:$0xff]  }
  0x48   :  { %v101_v13 = vld [vmem:[%s1973_s0] sm:$0xff]  ;;  %v1575_v17 = vld [vmem:[#allocation4 + $0x70] ss:$8 sps:$4 sm:$0xff]   ;;  %v1579_v20 = vld [vmem:[#allocation4 + $0x94] ss:$8 sps:$4 sm:$0xff]  }
  0x49   :  { %304 = vmatpush1.bf16.msra.mxu0 %v1557_v3  ;;  %v1456_v14 = vcombine.high %v101_v13, %v101_v13  ;;  %v1576_v18 = vld [vmem:[#allocation4 + $0x84] ss:$8 sps:$4 sm:$0xff]   ;;  %v1578_v19 = vld [vmem:[#allocation4 + $0x80] ss:$8 sps:$4 sm:$0xff]   ;;  %v1581_v21 = vld [vmem:[#allocation4 + $0x90] ss:$8 sps:$4 sm:$0xff]   ;;  %v1455_v34 = vcombine.low %v101_v13, %v101_v13 }
  0x4a   :  { %305 = vmatprep.subr.bf16.mxu0 %v1558_v4  ;;  %v1582_v22 = vld [vmem:[#allocation4 + $0xa4] ss:$8 sps:$4 sm:$0xff]   ;;  %v1584_v23 = vld [vmem:[#allocation4 + $0xa0] ss:$8 sps:$4 sm:$0xff]   ;;  %v1585_v24 = vld [vmem:[#allocation4 + $0xb4] ss:$8 sps:$4 sm:$0xff]  }
  0x4b   :  { %333 = vmatprep.mubr.bf16.mxu0 %v1456_v14  ;;  %v1587_v25 = vld [vmem:[#allocation4 + $0xb0] ss:$8 sps:$4 sm:$0xff]   ;;  %v1588_v26 = vld [vmem:[#allocation4 + $0xc4] ss:$8 sps:$4 sm:$0xff]   ;;  %v1590_v27 = vld [vmem:[#allocation4 + $0xc0] ss:$8 sps:$4 sm:$0xff]  }
  0x4c   :  { %v1591_v28 = vld [vmem:[#allocation4 + $0xd4] ss:$8 sps:$4 sm:$0xff]   ;;  %v1593_v29 = vld [vmem:[#allocation4 + $0xd0] ss:$8 sps:$4 sm:$0xff]   ;;  %v1594_v30 = vld [vmem:[#allocation4 + $0xe4] ss:$8 sps:$4 sm:$0xff]  }
  0x4d   :  { %306 = vmatpush1.bf16.msra.mxu0 %v1560_v5  ;;  %v1596_v31 = vld [vmem:[#allocation4 + $0xe0] ss:$8 sps:$4 sm:$0xff]   ;;  %v1597_v32 = vld [vmem:[#allocation4 + $0xf4] ss:$8 sps:$4 sm:$0xff]   ;;  %v1599_v33 = vld [vmem:[#allocation4 + $0xf0] ss:$8 sps:$4 sm:$0xff]  }
  0x4e   :  { %307 = vmatprep.subr.bf16.mxu0 %v1561_v6  ;;  %v342_v43 = vld [vmem:[%s1974_s1] sm:$0xf] }
  0x4f   :  { %v345_v47 = vld [vmem:[#allocation7] sm:$0x3] }
  0x50   :  { %v350_v49 = vrot.slane %v345_v47, %v349_v46  ;;  %v354_v50 = vrot.slane %v345_v47, %v353_v48 }
  0x51   :  { %308 = vmatpush1.bf16.msra.mxu0 %v1563_v7 }
  0x52   :  { %309 = vmatprep.subr.bf16.mxu0 %v1564_v8 }
  0x55   :  { %310 = vmatpush1.bf16.msra.mxu0 %v1566_v9 }
  0x56   :  { %311 = vmatprep.subr.bf16.mxu0 %v1567_v10 }
  0x59   :  { %312 = vmatpush1.bf16.msra.mxu0 %v1569_v11 }
  0x5a   :  { %313 = vmatprep.subr.bf16.mxu0 %v1570_v12 }
  0x5d   :  { %314 = vmatpush1.bf16.msra.mxu0 %v1572_v15 }
  0x5e   :  { %315 = vmatprep.subr.bf16.mxu0 %v1573_v16 }
  0x61   :  { %316 = vmatpush1.bf16.msra.mxu0 %v1575_v17 }
  0x62   :  { %317 = vmatprep.subr.bf16.mxu0 %v1576_v18 }
  0x65   :  { %318 = vmatpush1.bf16.msra.mxu0 %v1578_v19 }
  0x66   :  { %319 = vmatprep.subr.bf16.mxu0 %v1579_v20 }
  0x69   :  { %320 = vmatpush1.bf16.msra.mxu0 %v1581_v21 }
  0x6a   :  { %321 = vmatprep.subr.bf16.mxu0 %v1582_v22 }
  0x6d   :  { %322 = vmatpush1.bf16.msra.mxu0 %v1584_v23 }
  0x6e   :  { %323 = vmatprep.subr.bf16.mxu0 %v1585_v24 }
  0x71   :  { %324 = vmatpush1.bf16.msra.mxu0 %v1587_v25 }
  0x72   :  { %325 = vmatprep.subr.bf16.mxu0 %v1588_v26 }
  0x75   :  { %326 = vmatpush1.bf16.msra.mxu0 %v1590_v27 }
  0x76   :  { %327 = vmatprep.subr.bf16.mxu0 %v1591_v28 }
  0x79   :  { %328 = vmatpush1.bf16.msra.mxu0 %v1593_v29 }
  0x7a   :  { %329 = vmatprep.subr.bf16.mxu0 %v1594_v30 }
  0x7d   :  { %330 = vmatpush1.bf16.msra.mxu0 %v1596_v31 }
  0x7e   :  { %331 = vmatprep.subr.bf16.mxu0 %v1597_v32 }
  0x81   :  { %332 = vmatpush1.bf16.msra.mxu0 %v1599_v33 }
  0x84   :  { %334 = vmatmul.mubr.bf16.vlgmr.msra.gmra.mrb[0].mxu0 %v1455_v34 }
  0x85   :  { %400 = vmatprep.mubr.bf16.mxu0 %v1737_v35 }
 0x157   :  { %v335_v36 = vpop.f32.mrb[0].mxu0 }
 0x158   :  { %v343_v37 = vpack.c.bf16 %v335_v36, %v335_v36  ;;  %v337_v38 = vpop.f32.mrb[1].mxu0 }
 0x159   :  { %v344_v39 = vpack.c.bf16 %v337_v38, %v337_v38  ;;  %v339_v40 = vpop.f32.mrb[2].mxu0 }
 0x15a   :  { %v363_v41 = vsel %vm361_vm0, %v343_v37, 0  ;;  %v340_v42 = vpop.f32.mrb[3].mxu0 }
 0x15b   :  { %1489 = vmatprep.subr.msk.bf16.mxu0 %vm361_vm0, %v344_v39 }
 0x15c   :  { %369 = vmatpush1.bf16.msra.mxu0 %v363_v41 }
 0x15f   :  { %1490 = vmatmul.mubr.msk.bf16.vlgmr.msra.gmra.mrb[4].mxu0 %vm357_vm1, %v342_v43 }
 0x232   :  { %v402_v51 = vpop.f32.mrb[4].mxu0 }
 0x233   :  { %v403_v52 = vadd.f32 %v402_v51, %v350_v49  ;;  %v404_v53 = vpop.f32.mrb[5].mxu0 }
 0x234   :  { %v405_v54 = vadd.f32 %v404_v53, %v354_v50  ;;  %v406_v55 = vpop.f32.mrb[6].mxu0 }
 0x235   :  { %409 = vst [vmem:[#allocation10] sm:$0xff] %v403_v52  ;;  %v407_v56 = vpop.f32.mrb[7].mxu0 }
 0x236   :  { %410 = vst [vmem:[#allocation10 + $0x8] sm:$0xff] %v405_v54 }
 0x237   :  { %1717 = dma.done.wait [#allocation3], 49152 }
 0x238   :  { %1718 = vsyncadd [#allocation3], 4294918144  ;;  %v417_v57 = vld [vmem:[#allocation2 + $0x8] sm:$0xff]  ;;  %v416_v59 = vld [vmem:[#allocation2] sm:$0xff]  ;;  %v1738_v7 = vmov 1966171168  }
 0x239   :  { %v513_v58 = vld [vmem:[#allocation2 + $0x308] sm:$0xff]  ;;  %890 = vmatprep.subr.bf16.mxu0 %v417_v57  ;;  %v512_v60 = vld [vmem:[#allocation2 + $0x300] sm:$0xff]  ;;  %v423_v61 = vld [vmem:[#allocation2 + $0x38] sm:$0xff]  ;;  %v835_v8 = vunpack.c.l.s4 %v1738_v7 }
 0x23a   :  { %931 = vmatprep.subr.bf16.mxu1 %v513_v58  ;;  %v519_v62 = vld [vmem:[#allocation2 + $0x338] sm:$0xff]  ;;  %891 = vmatpush1.bf16.msra.mxu0 %v416_v59  ;;  %v422_v63 = vld [vmem:[#allocation2 + $0x30] sm:$0xff]  ;;  %v429_v1 = vld [vmem:[#allocation2 + $0x68] sm:$0xff] }
 0x23b   :  { %932 = vmatpush1.bf16.msra.mxu1 %v512_v60  ;;  %892 = vmatprep.subr.bf16.mxu0 %v423_v61  ;;  %v518_v0 = vld [vmem:[#allocation2 + $0x330] sm:$0xff]  ;;  %v525_v2 = vld [vmem:[#allocation2 + $0x368] sm:$0xff]  ;;  %v428_v3 = vld [vmem:[#allocation2 + $0x60] sm:$0xff]  ;;  %v836_v13 = vunpack.c.0.s8 %v835_v8 }
 0x23c   :  { %933 = vmatprep.subr.bf16.mxu1 %v519_v62  ;;  %v524_v4 = vld [vmem:[#allocation2 + $0x360] sm:$0xff]  ;;  %v435_v5 = vld [vmem:[#allocation2 + $0x98] sm:$0xff]  ;;  %v434_v9 = vld [vmem:[#allocation2 + $0x90] sm:$0xff] }
 0x23d   :  { %v531_v6 = vld [vmem:[#allocation2 + $0x398] sm:$0xff]  ;;  %v530_v10 = vld [vmem:[#allocation2 + $0x390] sm:$0xff]  ;;  %v441_v11 = vld [vmem:[#allocation2 + $0xc8] sm:$0xff]  ;;  %v1851_v18 = vsub.s32 %v836_v13, %v1842_v45 }
 0x23e   :  { %893 = vmatpush1.bf16.msra.mxu0 %v422_v63  ;;  %v537_v12 = vld [vmem:[#allocation2 + $0x3c8] sm:$0xff]  ;;  %v440_v14 = vld [vmem:[#allocation2 + $0xc0] sm:$0xff]  ;;  %v447_v16 = vld [vmem:[#allocation2 + $0xf8] sm:$0xff] }
 0x23f   :  { %934 = vmatpush1.bf16.msra.mxu1 %v518_v0  ;;  %894 = vmatprep.subr.bf16.mxu0 %v429_v1  ;;  %v536_v15 = vld [vmem:[#allocation2 + $0x3c0] sm:$0xff]  ;;  %v543_v17 = vld [vmem:[#allocation2 + $0x3f8] sm:$0xff]  ;;  %v446_v19 = vld [vmem:[#allocation2 + $0xf0] sm:$0xff] }
 0x240   :  { %935 = vmatprep.subr.bf16.mxu1 %v525_v2  ;;  %v542_v20 = vld [vmem:[#allocation2 + $0x3f0] sm:$0xff]  ;;  %v453_v21 = vld [vmem:[#allocation2 + $0x128] sm:$0xff]  ;;  %v415_v23 = vld [vmem:[%s1977_s4] sm:$0xff]  ;;  %s1740_s4 = smov [#allocation10]  }
 0x241   :  { %v549_v22 = vld [vmem:[#allocation2 + $0x428] sm:$0xff]  ;;  %v1857_v24 = vrot.slane %v415_v23, %v1851_v18  ;;  %v833_v25 = vcombine.high %v415_v23, %v415_v23  ;;  %v452_v26 = vld [vmem:[#allocation2 + $0x120] sm:$0xff]  ;;  %v459_v28 = vld [vmem:[#allocation2 + $0x158] sm:$0xff]  ;;  %s1423_s14 = sshll.u32 %s1740_s4, 4  ;;  %s1424_s14 = int_to_ptr.vmem [resolvable:$true] %s1423_s14 }
 0x242   :  { %895 = vmatpush1.bf16.msra.mxu0 %v428_v3  ;;  %v548_v27 = vld [vmem:[#allocation2 + $0x420] sm:$0xff]  ;;  %v555_v29 = vld [vmem:[#allocation2 + $0x458] sm:$0xff]  ;;  %v458_v33 = vld [vmem:[#allocation2 + $0x150] sm:$0xff]  ;;  %s1669_s15 = scalar_lea.vmem %s1424_s14, 256  ;;  %p1674_p11 = scmp.lt.s32.totalorder %s1424_s14, %s1424_s14 }
 0x243   :  { %936 = vmatpush1.bf16.msra.mxu1 %v524_v4  ;;  %896 = vmatprep.subr.bf16.mxu0 %v435_v5  ;;  %v848_v30 = vcombine.high %v1857_v24, %v1857_v24  ;;  %v1862_v31 = vrot.slane %v833_v25, %v1851_v18  ;;  %v554_v34 = vld [vmem:[#allocation2 + $0x450] sm:$0xff]  ;;  %v465_v36 = vld [vmem:[#allocation2 + $0x188] sm:$0xff]  ;;  %v464_v39 = vld [vmem:[#allocation2 + $0x180] sm:$0xff]  ;;  %p1670_p10 = scmp.ne.s32.totalorder %s1424_s14, %s1669_s15  ;;  %p1675_p12 = scmp.lt.s32.totalorder %s1669_s15, %s1669_s15 }
 0x244   :  { %937 = vmatprep.subr.bf16.mxu1 %v531_v6  ;;  %v561_v37 = vld [vmem:[#allocation2 + $0x488] sm:$0xff]  ;;  %v560_v40 = vld [vmem:[#allocation2 + $0x480] sm:$0xff]  ;;  %v471_v41 = vld [vmem:[#allocation2 + $0x1b8] sm:$0xff]  ;;  %v1879_v6 = vrot.slane %v1857_v24, %v1851_v18 }
 0x245   :  { %v1865_v32 = vrot.slane %v848_v30, %v1851_v18  ;;  %v1869_v35 = vrot.slane %v1862_v31, %v1851_v18  ;;  %v567_v42 = vld [vmem:[#allocation2 + $0x4b8] sm:$0xff]  ;;  %v470_v43 = vld [vmem:[#allocation2 + $0x1b0] sm:$0xff]  ;;  %v477_v47 = vld [vmem:[#allocation2 + $0x1e8] sm:$0xff]  ;;  %p1676_p13 = por %p1675_p12, %p1674_p11 }
 0x246   :  { %897 = vmatpush1.bf16.msra.mxu0 %v434_v9  ;;  %v566_v44 = vld [vmem:[#allocation2 + $0x4b0] sm:$0xff]  ;;  %v573_v49 = vld [vmem:[#allocation2 + $0x4e8] sm:$0xff]  ;;  %v476_v50 = vld [vmem:[#allocation2 + $0x1e0] sm:$0xff] }
 0x247   :  { %938 = vmatpush1.bf16.msra.mxu1 %v530_v10  ;;  %898 = vmatprep.subr.bf16.mxu0 %v441_v11  ;;  %v1874_v38 = vcombine.high %v1865_v32, %v1865_v32  ;;  %v572_v51 = vld [vmem:[#allocation2 + $0x4e0] sm:$0xff]  ;;  %v483_v52 = vld [vmem:[#allocation2 + $0x218] sm:$0xff]  ;;  %v482_v54 = vld [vmem:[#allocation2 + $0x210] sm:$0xff]  ;;  %v849_v11 = vcombine.high %v1862_v31, %v1862_v31  ;;  %p1677_p0 = pnand %p1676_p13, %p1670_p10 }
 0x248   :  { %939 = vmatprep.subr.bf16.mxu1 %v537_v12  ;;  %922 = vmatprep.mubr.bf16.mxu0 %v1865_v32  ;;  %v579_v53 = vld [vmem:[#allocation2 + $0x518] sm:$0xff]  ;;  %v578_v55 = vld [vmem:[#allocation2 + $0x510] sm:$0xff]  ;;  %v489_v56 = vld [vmem:[#allocation2 + $0x248] sm:$0xff]  ;;  %v1885_v12 = vcombine.high %v1879_v6, %v1879_v6 }
 0x249   :  { %963 = vmatprep.mubr.bf16.mxu1 %v1874_v38  ;;  %v585_v57 = vld [vmem:[#allocation2 + $0x548] sm:$0xff]  ;;  %v488_v58 = vld [vmem:[#allocation2 + $0x240] sm:$0xff]  ;;  %v495_v60 = vld [vmem:[#allocation2 + $0x278] sm:$0xff] }
 0x24a   :  { %899 = vmatpush1.bf16.msra.mxu0 %v440_v14  ;;  %v584_v59 = vld [vmem:[#allocation2 + $0x540] sm:$0xff]  ;;  %v591_v61 = vld [vmem:[#allocation2 + $0x578] sm:$0xff]  ;;  %v494_v62 = vld [vmem:[#allocation2 + $0x270] sm:$0xff] }
 0x24b   :  { %940 = vmatpush1.bf16.msra.mxu1 %v536_v15  ;;  %900 = vmatprep.subr.bf16.mxu0 %v447_v16  ;;  %v590_v63 = vld [vmem:[#allocation2 + $0x570] sm:$0xff]  ;;  %v501_v0 = vld [vmem:[#allocation2 + $0x2a8] sm:$0xff]  ;;  %v500_v2 = vld [vmem:[#allocation2 + $0x2a0] sm:$0xff] }
 0x24c   :  { %941 = vmatprep.subr.bf16.mxu1 %v543_v17  ;;  %v597_v1 = vld [vmem:[#allocation2 + $0x5a8] sm:$0xff]  ;;  %v596_v3 = vld [vmem:[#allocation2 + $0x5a0] sm:$0xff]  ;;  %v507_v4 = vld [vmem:[#allocation2 + $0x2d8] sm:$0xff]  ;;  %v1888_v17 = vrot.slane %v849_v11, %v1851_v18 }
 0x24d   :  { %v603_v5 = vld [vmem:[#allocation2 + $0x5d8] sm:$0xff]  ;;  %v506_v7 = vld [vmem:[#allocation2 + $0x2d0] sm:$0xff]  ;;  %v609_v9 = vld [vmem:[#allocation2 + $0x608] sm:$0xff] }
 0x24e   :  { %901 = vmatpush1.bf16.msra.mxu0 %v446_v19  ;;  %v602_v8 = vld [vmem:[#allocation2 + $0x5d0] sm:$0xff]  ;;  %v419_v10 = vld [vmem:[#allocation2 + $0x18] sm:$0xff]  ;;  %v608_v13 = vld [vmem:[#allocation2 + $0x600] sm:$0xff] }
 0x24f   :  { %942 = vmatpush1.bf16.msra.mxu1 %v542_v20  ;;  %902 = vmatprep.subr.bf16.mxu0 %v453_v21  ;;  %v418_v14 = vld [vmem:[#allocation2 + $0x10] sm:$0xff]  ;;  %v615_v15 = vld [vmem:[#allocation2 + $0x638] sm:$0xff]  ;;  %v425_v16 = vld [vmem:[#allocation2 + $0x48] sm:$0xff] }
 0x250   :  { %943 = vmatprep.subr.bf16.mxu1 %v549_v22  ;;  %v614_v19 = vld [vmem:[#allocation2 + $0x630] sm:$0xff]  ;;  %v424_v20 = vld [vmem:[#allocation2 + $0x40] sm:$0xff]  ;;  %v621_v21 = vld [vmem:[#allocation2 + $0x668] sm:$0xff] }
 0x251   :  { %v431_v22 = vld [vmem:[#allocation2 + $0x78] sm:$0xff]  ;;  %v620_v18 = vld [vmem:[#allocation2 + $0x660] sm:$0xff]  ;;  %v430_v23 = vld [vmem:[#allocation2 + $0x70] sm:$0xff] }
 0x252   :  { %903 = vmatpush1.bf16.msra.mxu0 %v452_v26  ;;  %v627_v24 = vld [vmem:[#allocation2 + $0x698] sm:$0xff]  ;;  %v437_v25 = vld [vmem:[#allocation2 + $0xa8] sm:$0xff]  ;;  %v626_v26 = vld [vmem:[#allocation2 + $0x690] sm:$0xff] }
 0x253   :  { %944 = vmatpush1.bf16.msra.mxu1 %v548_v27  ;;  %904 = vmatprep.subr.bf16.mxu0 %v459_v28  ;;  %v436_v27 = vld [vmem:[#allocation2 + $0xa0] sm:$0xff]  ;;  %v633_v28 = vld [vmem:[#allocation2 + $0x6c8] sm:$0xff]  ;;  %v442_v31 = vld [vmem:[#allocation2 + $0xd0] sm:$0xff] }
 0x254   :  { %945 = vmatprep.subr.bf16.mxu1 %v555_v29  ;;  %v443_v29 = vld [vmem:[#allocation2 + $0xd8] sm:$0xff]  ;;  %v632_v30 = vld [vmem:[#allocation2 + $0x6c0] sm:$0xff]  ;;  %v693_v11 = vld [vmem:[#allocation2 + $0x8a8] sm:$0xff] }
 0x256   :  { %905 = vmatpush1.bf16.msra.mxu0 %v458_v33  ;;  %v639_v33 = vld [vmem:[#allocation2 + $0x6f8] sm:$0xff] }
 0x257   :  { %946 = vmatpush1.bf16.msra.mxu1 %v554_v34  ;;  %906 = vmatprep.subr.bf16.mxu0 %v465_v36  ;;  %v449_v34 = vld [vmem:[#allocation2 + $0x108] sm:$0xff]  ;;  %v638_v36 = vld [vmem:[#allocation2 + $0x6f0] sm:$0xff] }
 0x258   :  { %947 = vmatprep.subr.bf16.mxu1 %v561_v37  ;;  %v448_v37 = vld [vmem:[#allocation2 + $0x100] sm:$0xff] }
 0x25a   :  { %907 = vmatpush1.bf16.msra.mxu0 %v464_v39  ;;  %v645_v39 = vld [vmem:[#allocation2 + $0x728] sm:$0xff] }
 0x25b   :  { %948 = vmatpush1.bf16.msra.mxu1 %v560_v40  ;;  %908 = vmatprep.subr.bf16.mxu0 %v471_v41  ;;  %v455_v40 = vld [vmem:[#allocation2 + $0x138] sm:$0xff]  ;;  %v644_v41 = vld [vmem:[#allocation2 + $0x720] sm:$0xff] }
 0x25c   :  { %949 = vmatprep.subr.bf16.mxu1 %v567_v42  ;;  %v454_v42 = vld [vmem:[#allocation2 + $0x130] sm:$0xff] }
 0x25e   :  { %909 = vmatpush1.bf16.msra.mxu0 %v470_v43  ;;  %v651_v43 = vld [vmem:[#allocation2 + $0x758] sm:$0xff] }
 0x25f   :  { %950 = vmatpush1.bf16.msra.mxu1 %v566_v44  ;;  %910 = vmatprep.subr.bf16.mxu0 %v477_v47  ;;  %v461_v44 = vld [vmem:[#allocation2 + $0x168] sm:$0xff]  ;;  %v650_v47 = vld [vmem:[#allocation2 + $0x750] sm:$0xff] }
 0x260   :  { %951 = vmatprep.subr.bf16.mxu1 %v573_v49  ;;  %v460_v49 = vld [vmem:[#allocation2 + $0x160] sm:$0xff] }
 0x262   :  { %911 = vmatpush1.bf16.msra.mxu0 %v476_v50  ;;  %v657_v50 = vld [vmem:[#allocation2 + $0x788] sm:$0xff] }
 0x263   :  { %952 = vmatpush1.bf16.msra.mxu1 %v572_v51  ;;  %912 = vmatprep.subr.bf16.mxu0 %v483_v52  ;;  %v467_v51 = vld [vmem:[#allocation2 + $0x198] sm:$0xff]  ;;  %v656_v52 = vld [vmem:[#allocation2 + $0x780] sm:$0xff] }
 0x264   :  { %953 = vmatprep.subr.bf16.mxu1 %v579_v53  ;;  %v466_v53 = vld [vmem:[#allocation2 + $0x190] sm:$0xff] }
 0x266   :  { %913 = vmatpush1.bf16.msra.mxu0 %v482_v54  ;;  %v663_v54 = vld [vmem:[#allocation2 + $0x7b8] sm:$0xff] }
 0x267   :  { %954 = vmatpush1.bf16.msra.mxu1 %v578_v55  ;;  %914 = vmatprep.subr.bf16.mxu0 %v489_v56  ;;  %v473_v55 = vld [vmem:[#allocation2 + $0x1c8] sm:$0xff]  ;;  %v662_v56 = vld [vmem:[#allocation2 + $0x7b0] sm:$0xff] }
 0x268   :  { %955 = vmatprep.subr.bf16.mxu1 %v585_v57  ;;  %v472_v57 = vld [vmem:[#allocation2 + $0x1c0] sm:$0xff] }
 0x26a   :  { %915 = vmatpush1.bf16.msra.mxu0 %v488_v58  ;;  %v669_v58 = vld [vmem:[#allocation2 + $0x7e8] sm:$0xff] }
 0x26b   :  { %956 = vmatpush1.bf16.msra.mxu1 %v584_v59  ;;  %916 = vmatprep.subr.bf16.mxu0 %v495_v60  ;;  %v479_v59 = vld [vmem:[#allocation2 + $0x1f8] sm:$0xff]  ;;  %v668_v60 = vld [vmem:[#allocation2 + $0x7e0] sm:$0xff] }
 0x26c   :  { %957 = vmatprep.subr.bf16.mxu1 %v591_v61  ;;  %v478_v61 = vld [vmem:[#allocation2 + $0x1f0] sm:$0xff] }
 0x26e   :  { %917 = vmatpush1.bf16.msra.mxu0 %v494_v62  ;;  %v675_v62 = vld [vmem:[#allocation2 + $0x818] sm:$0xff] }
 0x26f   :  { %958 = vmatpush1.bf16.msra.mxu1 %v590_v63  ;;  %918 = vmatprep.subr.bf16.mxu0 %v501_v0  ;;  %v485_v63 = vld [vmem:[#allocation2 + $0x228] sm:$0xff]  ;;  %v674_v0 = vld [vmem:[#allocation2 + $0x810] sm:$0xff] }
 0x270   :  { %959 = vmatprep.subr.bf16.mxu1 %v597_v1  ;;  %v484_v1 = vld [vmem:[#allocation2 + $0x220] sm:$0xff] }
 0x272   :  { %919 = vmatpush1.bf16.msra.mxu0 %v500_v2  ;;  %v681_v2 = vld [vmem:[#allocation2 + $0x848] sm:$0xff] }
 0x273   :  { %960 = vmatpush1.bf16.msra.mxu1 %v596_v3  ;;  %920 = vmatprep.subr.bf16.mxu0 %v507_v4  ;;  %v491_v3 = vld [vmem:[#allocation2 + $0x258] sm:$0xff]  ;;  %v680_v4 = vld [vmem:[#allocation2 + $0x840] sm:$0xff] }
 0x274   :  { %961 = vmatprep.subr.bf16.mxu1 %v603_v5  ;;  %v490_v5 = vld [vmem:[#allocation2 + $0x250] sm:$0xff] }
 0x276   :  { %921 = vmatpush1.bf16.msra.mxu0 %v506_v7  ;;  %v687_v7 = vld [vmem:[#allocation2 + $0x878] sm:$0xff] }
 0x277   :  { %962 = vmatpush1.bf16.msra.mxu1 %v602_v8  ;;  %1054 = vmatprep.subr.bf16.mxu0 %v419_v10  ;;  %v497_v8 = vld [vmem:[#allocation2 + $0x288] sm:$0xff]  ;;  %v496_v10 = vld [vmem:[#allocation2 + $0x280] sm:$0xff] }
 0x278   :  { %972 = vmatprep.subr.bf16.mxu1 %v609_v9  ;;  %v686_v9 = vld [vmem:[#allocation2 + $0x870] sm:$0xff] }
 0x279   :  { %923 = vmatmul.mubr.bf16.vlgmr.msra.gmra.mrb[8].mxu0 %v1879_v6 }
 0x27a   :  { %964 = vmatmul.mubr.bf16.vlgmr.msra.gmra.mrb[0].mxu1 %v1885_v12  ;;  %1055 = vmatpush1.bf16.msra.mxu0 %v418_v14  ;;  %v692_v14 = vld [vmem:[#allocation2 + $0x8a0] sm:$0xff] }
 0x27b   :  { %973 = vmatpush1.bf16.msra.mxu1 %v608_v13  ;;  %1056 = vmatprep.subr.bf16.mxu0 %v425_v16  ;;  %v503_v13 = vld [vmem:[#allocation2 + $0x2b8] sm:$0xff] }
 0x27c   :  { %974 = vmatprep.subr.bf16.mxu1 %v615_v15  ;;  %1004 = vmatprep.mubr.bf16.mxu1 %v1888_v17  ;;  %v502_v15 = vld [vmem:[#allocation2 + $0x2b0] sm:$0xff]  ;;  %v699_v16 = vld [vmem:[#allocation2 + $0x8d8] sm:$0xff] }
 0x27d   :  { %1086 = vmatprep.mubr.bf16.mxu0 %v1865_v32 }
 0x27e   :  { %1057 = vmatpush1.bf16.msra.mxu0 %v424_v20  ;;  %v698_v20 = vld [vmem:[#allocation2 + $0x8d0] sm:$0xff] }
 0x27f   :  { %975 = vmatpush1.bf16.msra.mxu1 %v614_v19  ;;  %1058 = vmatprep.subr.bf16.mxu0 %v431_v22  ;;  %v509_v19 = vld [vmem:[#allocation2 + $0x2e8] sm:$0xff] }
 0x280   :  { %976 = vmatprep.subr.bf16.mxu1 %v621_v21  ;;  %v508_v21 = vld [vmem:[#allocation2 + $0x2e0] sm:$0xff]  ;;  %v705_v22 = vld [vmem:[#allocation2 + $0x908] sm:$0xff] }
 0x282   :  { %1059 = vmatpush1.bf16.msra.mxu0 %v430_v23  ;;  %v704_v23 = vld [vmem:[#allocation2 + $0x900] sm:$0xff] }
 0x283   :  { %977 = vmatpush1.bf16.msra.mxu1 %v620_v18  ;;  %1060 = vmatprep.subr.bf16.mxu0 %v437_v25  ;;  %v515_v18 = vld [vmem:[#allocation2 + $0x318] sm:$0xff] }
 0x284   :  { %978 = vmatprep.subr.bf16.mxu1 %v627_v24  ;;  %v514_v24 = vld [vmem:[#allocation2 + $0x310] sm:$0xff]  ;;  %v711_v25 = vld [vmem:[#allocation2 + $0x938] sm:$0xff] }
 0x286   :  { %1061 = vmatpush1.bf16.msra.mxu0 %v436_v27  ;;  %v1896_v27 = vcombine.high %v1888_v17, %v1888_v17 }
 0x287   :  { %979 = vmatpush1.bf16.msra.mxu1 %v626_v26  ;;  %1062 = vmatprep.subr.bf16.mxu0 %v443_v29  ;;  %v521_v26 = vld [vmem:[#allocation2 + $0x348] sm:$0xff]  ;;  %v520_v29 = vld [vmem:[#allocation2 + $0x340] sm:$0xff] }
 0x288   :  { %980 = vmatprep.subr.bf16.mxu1 %v633_v28  ;;  %v710_v28 = vld [vmem:[#allocation2 + $0x930] sm:$0xff] }
 0x28a   :  { %1063 = vmatpush1.bf16.msra.mxu0 %v442_v31  ;;  %v527_v31 = vld [vmem:[#allocation2 + $0x378] sm:$0xff] }
 0x28b   :  { %981 = vmatpush1.bf16.msra.mxu1 %v632_v30  ;;  %1064 = vmatprep.subr.bf16.mxu0 %v449_v34  ;;  %v717_v30 = vld [vmem:[#allocation2 + $0x968] sm:$0xff]  ;;  %v526_v34 = vld [vmem:[#allocation2 + $0x370] sm:$0xff] }
 0x28c   :  { %982 = vmatprep.subr.bf16.mxu1 %v639_v33  ;;  %v716_v33 = vld [vmem:[#allocation2 + $0x960] sm:$0xff] }
 0x28e   :  { %1065 = vmatpush1.bf16.msra.mxu0 %v448_v37  ;;  %v533_v37 = vld [vmem:[#allocation2 + $0x3a8] sm:$0xff] }
 0x28f   :  { %983 = vmatpush1.bf16.msra.mxu1 %v638_v36  ;;  %1066 = vmatprep.subr.bf16.mxu0 %v455_v40  ;;  %v723_v36 = vld [vmem:[#allocation2 + $0x998] sm:$0xff]  ;;  %v532_v40 = vld [vmem:[#allocation2 + $0x3a0] sm:$0xff] }
 0x290   :  { %984 = vmatprep.subr.bf16.mxu1 %v645_v39  ;;  %v722_v39 = vld [vmem:[#allocation2 + $0x990] sm:$0xff] }
 0x292   :  { %1067 = vmatpush1.bf16.msra.mxu0 %v454_v42  ;;  %v539_v42 = vld [vmem:[#allocation2 + $0x3d8] sm:$0xff] }
 0x293   :  { %985 = vmatpush1.bf16.msra.mxu1 %v644_v41  ;;  %1068 = vmatprep.subr.bf16.mxu0 %v461_v44  ;;  %v729_v41 = vld [vmem:[#allocation2 + $0x9c8] sm:$0xff]  ;;  %v538_v44 = vld [vmem:[#allocation2 + $0x3d0] sm:$0xff] }
 0x294   :  { %986 = vmatprep.subr.bf16.mxu1 %v651_v43  ;;  %v728_v43 = vld [vmem:[#allocation2 + $0x9c0] sm:$0xff] }
 0x296   :  { %1069 = vmatpush1.bf16.msra.mxu0 %v460_v49  ;;  %v545_v49 = vld [vmem:[#allocation2 + $0x408] sm:$0xff] }
 0x297   :  { %987 = vmatpush1.bf16.msra.mxu1 %v650_v47  ;;  %1070 = vmatprep.subr.bf16.mxu0 %v467_v51  ;;  %v735_v47 = vld [vmem:[#allocation2 + $0x9f8] sm:$0xff]  ;;  %v544_v51 = vld [vmem:[#allocation2 + $0x400] sm:$0xff] }
 0x298   :  { %988 = vmatprep.subr.bf16.mxu1 %v657_v50  ;;  %v734_v50 = vld [vmem:[#allocation2 + $0x9f0] sm:$0xff] }
 0x29a   :  { %1071 = vmatpush1.bf16.msra.mxu0 %v466_v53  ;;  %v551_v53 = vld [vmem:[#allocation2 + $0x438] sm:$0xff] }
 0x29b   :  { %989 = vmatpush1.bf16.msra.mxu1 %v656_v52  ;;  %1072 = vmatprep.subr.bf16.mxu0 %v473_v55  ;;  %v741_v52 = vld [vmem:[#allocation2 + $0xa28] sm:$0xff]  ;;  %v550_v55 = vld [vmem:[#allocation2 + $0x430] sm:$0xff] }
 0x29c   :  { %990 = vmatprep.subr.bf16.mxu1 %v663_v54  ;;  %v740_v54 = vld [vmem:[#allocation2 + $0xa20] sm:$0xff] }
 0x29e   :  { %1073 = vmatpush1.bf16.msra.mxu0 %v472_v57  ;;  %v557_v57 = vld [vmem:[#allocation2 + $0x468] sm:$0xff] }
 0x29f   :  { %991 = vmatpush1.bf16.msra.mxu1 %v662_v56  ;;  %1074 = vmatprep.subr.bf16.mxu0 %v479_v59  ;;  %v747_v56 = vld [vmem:[#allocation2 + $0xa58] sm:$0xff]  ;;  %v556_v59 = vld [vmem:[#allocation2 + $0x460] sm:$0xff] }
 0x2a0   :  { %992 = vmatprep.subr.bf16.mxu1 %v669_v58  ;;  %v746_v58 = vld [vmem:[#allocation2 + $0xa50] sm:$0xff] }
 0x2a2   :  { %1075 = vmatpush1.bf16.msra.mxu0 %v478_v61  ;;  %v563_v61 = vld [vmem:[#allocation2 + $0x498] sm:$0xff] }
 0x2a3   :  { %993 = vmatpush1.bf16.msra.mxu1 %v668_v60  ;;  %1076 = vmatprep.subr.bf16.mxu0 %v485_v63  ;;  %v753_v60 = vld [vmem:[#allocation2 + $0xa88] sm:$0xff]  ;;  %v562_v63 = vld [vmem:[#allocation2 + $0x490] sm:$0xff] }
 0x2a4   :  { %994 = vmatprep.subr.bf16.mxu1 %v675_v62  ;;  %v752_v62 = vld [vmem:[#allocation2 + $0xa80] sm:$0xff] }
 0x2a6   :  { %1077 = vmatpush1.bf16.msra.mxu0 %v484_v1  ;;  %v569_v1 = vld [vmem:[#allocation2 + $0x4c8] sm:$0xff] }
 0x2a7   :  { %995 = vmatpush1.bf16.msra.mxu1 %v674_v0  ;;  %1078 = vmatprep.subr.bf16.mxu0 %v491_v3  ;;  %v759_v0 = vld [vmem:[#allocation2 + $0xab8] sm:$0xff]  ;;  %v568_v3 = vld [vmem:[#allocation2 + $0x4c0] sm:$0xff] }
 0x2a8   :  { %996 = vmatprep.subr.bf16.mxu1 %v681_v2  ;;  %v758_v2 = vld [vmem:[#allocation2 + $0xab0] sm:$0xff] }
 0x2aa   :  { %1079 = vmatpush1.bf16.msra.mxu0 %v490_v5  ;;  %v575_v5 = vld [vmem:[#allocation2 + $0x4f8] sm:$0xff] }
 0x2ab   :  { %997 = vmatpush1.bf16.msra.mxu1 %v680_v4  ;;  %1080 = vmatprep.subr.bf16.mxu0 %v497_v8  ;;  %v765_v4 = vld [vmem:[#allocation2 + $0xae8] sm:$0xff]  ;;  %v574_v8 = vld [vmem:[#allocation2 + $0x4f0] sm:$0xff] }
 0x2ac   :  { %998 = vmatprep.subr.bf16.mxu1 %v687_v7  ;;  %v764_v7 = vld [vmem:[#allocation2 + $0xae0] sm:$0xff] }
 0x2ae   :  { %1081 = vmatpush1.bf16.msra.mxu0 %v496_v10  ;;  %v581_v10 = vld [vmem:[#allocation2 + $0x528] sm:$0xff] }
 0x2af   :  { %999 = vmatpush1.bf16.msra.mxu1 %v686_v9  ;;  %1082 = vmatprep.subr.bf16.mxu0 %v503_v13  ;;  %v771_v9 = vld [vmem:[#allocation2 + $0xb18] sm:$0xff]  ;;  %v580_v13 = vld [vmem:[#allocation2 + $0x520] sm:$0xff] }
 0x2b0   :  { %1000 = vmatprep.subr.bf16.mxu1 %v693_v11  ;;  %v770_v11 = vld [vmem:[#allocation2 + $0xb10] sm:$0xff] }
 0x2b2   :  { %1083 = vmatpush1.bf16.msra.mxu0 %v502_v15  ;;  %v587_v15 = vld [vmem:[#allocation2 + $0x558] sm:$0xff] }
 0x2b3   :  { %1001 = vmatpush1.bf16.msra.mxu1 %v692_v14  ;;  %1084 = vmatprep.subr.bf16.mxu0 %v509_v19  ;;  %v777_v14 = vld [vmem:[#allocation2 + $0xb48] sm:$0xff]  ;;  %v586_v19 = vld [vmem:[#allocation2 + $0x550] sm:$0xff] }
 0x2b4   :  { %1002 = vmatprep.subr.bf16.mxu1 %v699_v16  ;;  %v776_v16 = vld [vmem:[#allocation2 + $0xb40] sm:$0xff] }
 0x2b6   :  { %1085 = vmatpush1.bf16.msra.mxu0 %v508_v21  ;;  %v593_v21 = vld [vmem:[#allocation2 + $0x588] sm:$0xff] }
 0x2b7   :  { %1003 = vmatpush1.bf16.msra.mxu1 %v698_v20  ;;  %1095 = vmatprep.subr.bf16.mxu0 %v515_v18  ;;  %v783_v20 = vld [vmem:[#allocation2 + $0xb78] sm:$0xff]  ;;  %v592_v18 = vld [vmem:[#allocation2 + $0x580] sm:$0xff] }
 0x2b8   :  { %1013 = vmatprep.subr.bf16.mxu1 %v705_v22  ;;  %v782_v22 = vld [vmem:[#allocation2 + $0xb70] sm:$0xff] }
 0x2b9   :  { %1087 = vmatmul.mubr.bf16.vlgmr.msra.gmra.mrb[12].mxu0 %v1879_v6 }
 0x2ba   :  { %1005 = vmatmul.mubr.bf16.vlgmr.msra.gmra.mrb[0].mxu1 %v1869_v35  ;;  %1096 = vmatpush1.bf16.msra.mxu0 %v514_v24  ;;  %v599_v24 = vld [vmem:[#allocation2 + $0x5b8] sm:$0xff] }
 0x2bb   :  { %1014 = vmatpush1.bf16.msra.mxu1 %v704_v23  ;;  %1097 = vmatprep.subr.bf16.mxu0 %v521_v26  ;;  %v789_v23 = vld [vmem:[#allocation2 + $0xba8] sm:$0xff]  ;;  %v598_v26 = vld [vmem:[#allocation2 + $0x5b0] sm:$0xff] }
 0x2bc   :  { %1015 = vmatprep.subr.bf16.mxu1 %v711_v25  ;;  %1045 = vmatprep.mubr.bf16.mxu1 %v1896_v27  ;;  %v788_v25 = vld [vmem:[#allocation2 + $0xba0] sm:$0xff] }
 0x2bd   :  { %1127 = vmatprep.mubr.bf16.mxu0 %v1874_v38 }
 0x2be   :  { %1098 = vmatpush1.bf16.msra.mxu0 %v520_v29  ;;  %v605_v29 = vld [vmem:[#allocation2 + $0x5e8] sm:$0xff] }
 0x2bf   :  { %1016 = vmatpush1.bf16.msra.mxu1 %v710_v28  ;;  %1099 = vmatprep.subr.bf16.mxu0 %v527_v31  ;;  %v795_v28 = vld [vmem:[#allocation2 + $0xbd8] sm:$0xff]  ;;  %v604_v31 = vld [vmem:[#allocation2 + $0x5e0] sm:$0xff] }
 0x2c0   :  { %1017 = vmatprep.subr.bf16.mxu1 %v717_v30  ;;  %v794_v30 = vld [vmem:[#allocation2 + $0xbd0] sm:$0xff] }
 0x2c2   :  { %1100 = vmatpush1.bf16.msra.mxu0 %v526_v34  ;;  %v421_v34 = vld [vmem:[#allocation2 + $0x28] sm:$0xff] }
 0x2c3   :  { %1018 = vmatpush1.bf16.msra.mxu1 %v716_v33  ;;  %1101 = vmatprep.subr.bf16.mxu0 %v533_v37  ;;  %v611_v33 = vld [vmem:[#allocation2 + $0x618] sm:$0xff]  ;;  %v610_v37 = vld [vmem:[#allocation2 + $0x610] sm:$0xff] }
 0x2c4   :  { %1019 = vmatprep.subr.bf16.mxu1 %v723_v36  ;;  %v1904_v36 = vcombine.high %v1869_v35, %v1869_v35 }
 0x2c6   :  { %1102 = vmatpush1.bf16.msra.mxu0 %v532_v40  ;;  %v617_v40 = vld [vmem:[#allocation2 + $0x648] sm:$0xff] }
 0x2c7   :  { %1020 = vmatpush1.bf16.msra.mxu1 %v722_v39  ;;  %1103 = vmatprep.subr.bf16.mxu0 %v539_v42  ;;  %v420_v39 = vld [vmem:[#allocation2 + $0x20] sm:$0xff] }
 0x2c8   :  { %1021 = vmatprep.subr.bf16.mxu1 %v729_v41  ;;  %v427_v41 = vld [vmem:[#allocation2 + $0x58] sm:$0xff]  ;;  %v616_v42 = vld [vmem:[#allocation2 + $0x640] sm:$0xff] }
 0x2ca   :  { %1104 = vmatpush1.bf16.msra.mxu0 %v538_v44  ;;  %v623_v44 = vld [vmem:[#allocation2 + $0x678] sm:$0xff] }
 0x2cb   :  { %1022 = vmatpush1.bf16.msra.mxu1 %v728_v43  ;;  %1105 = vmatprep.subr.bf16.mxu0 %v545_v49  ;;  %v426_v43 = vld [vmem:[#allocation2 + $0x50] sm:$0xff] }
 0x2cc   :  { %1023 = vmatprep.subr.bf16.mxu1 %v735_v47  ;;  %v433_v47 = vld [vmem:[#allocation2 + $0x88] sm:$0xff]  ;;  %v622_v49 = vld [vmem:[#allocation2 + $0x670] sm:$0xff] }
 0x2ce   :  { %1106 = vmatpush1.bf16.msra.mxu0 %v544_v51  ;;  %v629_v51 = vld [vmem:[#allocation2 + $0x6a8] sm:$0xff] }
 0x2cf   :  { %1024 = vmatpush1.bf16.msra.mxu1 %v734_v50  ;;  %1107 = vmatprep.subr.bf16.mxu0 %v551_v53  ;;  %v432_v50 = vld [vmem:[#allocation2 + $0x80] sm:$0xff] }
 0x2d0   :  { %1025 = vmatprep.subr.bf16.mxu1 %v741_v52  ;;  %v439_v52 = vld [vmem:[#allocation2 + $0xb8] sm:$0xff]  ;;  %v628_v53 = vld [vmem:[#allocation2 + $0x6a0] sm:$0xff] }
 0x2d2   :  { %1108 = vmatpush1.bf16.msra.mxu0 %v550_v55  ;;  %v635_v55 = vld [vmem:[#allocation2 + $0x6d8] sm:$0xff] }
 0x2d3   :  { %1026 = vmatpush1.bf16.msra.mxu1 %v740_v54  ;;  %1109 = vmatprep.subr.bf16.mxu0 %v557_v57  ;;  %v438_v54 = vld [vmem:[#allocation2 + $0xb0] sm:$0xff]  ;;  %v444_v57 = vld [vmem:[#allocation2 + $0xe0] sm:$0xff] }
 0x2d4   :  { %1027 = vmatprep.subr.bf16.mxu1 %v747_v56  ;;  %v445_v56 = vld [vmem:[#allocation2 + $0xe8] sm:$0xff] }
 0x2d6   :  { %1110 = vmatpush1.bf16.msra.mxu0 %v556_v59  ;;  %v451_v59 = vld [vmem:[#allocation2 + $0x118] sm:$0xff] }
 0x2d7   :  { %1028 = vmatpush1.bf16.msra.mxu1 %v746_v58  ;;  %1111 = vmatprep.subr.bf16.mxu0 %v563_v61  ;;  %v641_v58 = vld [vmem:[#allocation2 + $0x708] sm:$0xff]  ;;  %v450_v61 = vld [vmem:[#allocation2 + $0x110] sm:$0xff] }
 0x2d8   :  { %1029 = vmatprep.subr.bf16.mxu1 %v753_v60  ;;  %v640_v60 = vld [vmem:[#allocation2 + $0x700] sm:$0xff] }
 0x2da   :  { %1112 = vmatpush1.bf16.msra.mxu0 %v562_v63  ;;  %v457_v63 = vld [vmem:[#allocation2 + $0x148] sm:$0xff] }
 0x2db   :  { %1030 = vmatpush1.bf16.msra.mxu1 %v752_v62  ;;  %1113 = vmatprep.subr.bf16.mxu0 %v569_v1  ;;  %v647_v62 = vld [vmem:[#allocation2 + $0x738] sm:$0xff]  ;;  %v456_v1 = vld [vmem:[#allocation2 + $0x140] sm:$0xff] }
 0x2dc   :  { %1031 = vmatprep.subr.bf16.mxu1 %v759_v0  ;;  %v646_v0 = vld [vmem:[#allocation2 + $0x730] sm:$0xff] }
 0x2de   :  { %1114 = vmatpush1.bf16.msra.mxu0 %v568_v3  ;;  %v463_v3 = vld [vmem:[#allocation2 + $0x178] sm:$0xff] }
 0x2df   :  { %1032 = vmatpush1.bf16.msra.mxu1 %v758_v2  ;;  %1115 = vmatprep.subr.bf16.mxu0 %v575_v5  ;;  %v653_v2 = vld [vmem:[#allocation2 + $0x768] sm:$0xff]  ;;  %v462_v5 = vld [vmem:[#allocation2 + $0x170] sm:$0xff] }
 0x2e0   :  { %1033 = vmatprep.subr.bf16.mxu1 %v765_v4  ;;  %v652_v4 = vld [vmem:[#allocation2 + $0x760] sm:$0xff] }
 0x2e2   :  { %1116 = vmatpush1.bf16.msra.mxu0 %v574_v8  ;;  %v469_v8 = vld [vmem:[#allocation2 + $0x1a8] sm:$0xff] }
 0x2e3   :  { %1034 = vmatpush1.bf16.msra.mxu1 %v764_v7  ;;  %1117 = vmatprep.subr.bf16.mxu0 %v581_v10  ;;  %v659_v7 = vld [vmem:[#allocation2 + $0x798] sm:$0xff]  ;;  %v468_v10 = vld [vmem:[#allocation2 + $0x1a0] sm:$0xff] }
 0x2e4   :  { %1035 = vmatprep.subr.bf16.mxu1 %v771_v9  ;;  %v658_v9 = vld [vmem:[#allocation2 + $0x790] sm:$0xff] }
 0x2e6   :  { %1118 = vmatpush1.bf16.msra.mxu0 %v580_v13  ;;  %v475_v13 = vld [vmem:[#allocation2 + $0x1d8] sm:$0xff] }
 0x2e7   :  { %1036 = vmatpush1.bf16.msra.mxu1 %v770_v11  ;;  %1119 = vmatprep.subr.bf16.mxu0 %v587_v15  ;;  %v665_v11 = vld [vmem:[#allocation2 + $0x7c8] sm:$0xff]  ;;  %v474_v15 = vld [vmem:[#allocation2 + $0x1d0] sm:$0xff] }
 0x2e8   :  { %1037 = vmatprep.subr.bf16.mxu1 %v777_v14  ;;  %v664_v14 = vld [vmem:[#allocation2 + $0x7c0] sm:$0xff] }
 0x2ea   :  { %1120 = vmatpush1.bf16.msra.mxu0 %v586_v19  ;;  %v481_v19 = vld [vmem:[#allocation2 + $0x208] sm:$0xff] }
 0x2eb   :  { %1038 = vmatpush1.bf16.msra.mxu1 %v776_v16  ;;  %1121 = vmatprep.subr.bf16.mxu0 %v593_v21  ;;  %v671_v16 = vld [vmem:[#allocation2 + $0x7f8] sm:$0xff]  ;;  %v480_v21 = vld [vmem:[#allocation2 + $0x200] sm:$0xff] }
 0x2ec   :  { %1039 = vmatprep.subr.bf16.mxu1 %v783_v20  ;;  %v670_v20 = vld [vmem:[#allocation2 + $0x7f0] sm:$0xff] }
 0x2ee   :  { %1122 = vmatpush1.bf16.msra.mxu0 %v592_v18  ;;  %v487_v18 = vld [vmem:[#allocation2 + $0x238] sm:$0xff] }
 0x2ef   :  { %1040 = vmatpush1.bf16.msra.mxu1 %v782_v22  ;;  %1123 = vmatprep.subr.bf16.mxu0 %v599_v24  ;;  %v677_v22 = vld [vmem:[#allocation2 + $0x828] sm:$0xff]  ;;  %v486_v24 = vld [vmem:[#allocation2 + $0x230] sm:$0xff] }
 0x2f0   :  { %1041 = vmatprep.subr.bf16.mxu1 %v789_v23  ;;  %v676_v23 = vld [vmem:[#allocation2 + $0x820] sm:$0xff] }
 0x2f2   :  { %1124 = vmatpush1.bf16.msra.mxu0 %v598_v26  ;;  %v493_v26 = vld [vmem:[#allocation2 + $0x268] sm:$0xff] }
 0x2f3   :  { %1042 = vmatpush1.bf16.msra.mxu1 %v788_v25  ;;  %1125 = vmatprep.subr.bf16.mxu0 %v605_v29  ;;  %v683_v25 = vld [vmem:[#allocation2 + $0x858] sm:$0xff]  ;;  %v492_v29 = vld [vmem:[#allocation2 + $0x260] sm:$0xff] }
 0x2f4   :  { %1043 = vmatprep.subr.bf16.mxu1 %v795_v28  ;;  %v682_v28 = vld [vmem:[#allocation2 + $0x850] sm:$0xff] }
 0x2f6   :  { %1126 = vmatpush1.bf16.msra.mxu0 %v604_v31  ;;  %v499_v31 = vld [vmem:[#allocation2 + $0x298] sm:$0xff] }
 0x2f7   :  { %1044 = vmatpush1.bf16.msra.mxu1 %v794_v30  ;;  %1136 = vmatprep.subr.bf16.mxu0 %v611_v33  ;;  %v689_v30 = vld [vmem:[#allocation2 + $0x888] sm:$0xff]  ;;  %v688_v33 = vld [vmem:[#allocation2 + $0x880] sm:$0xff] }
 0x2f8   :  { %1218 = vmatprep.subr.bf16.mxu1 %v421_v34  ;;  %v498_v34 = vld [vmem:[#allocation2 + $0x290] sm:$0xff] }
 0x2f9   :  { %1128 = vmatmul.mubr.bf16.vlgmr.msra.gmra.mrb[12].mxu0 %v1885_v12 }
 0x2fa   :  { %1046 = vmatmul.mubr.bf16.vlgmr.msra.gmra.mrb[0].mxu1 %v1904_v36  ;;  %1137 = vmatpush1.bf16.msra.mxu0 %v610_v37  ;;  %v695_v37 = vld [vmem:[#allocation2 + $0x8b8] sm:$0xff] }
 0x2fb   :  { %1219 = vmatpush1.bf16.msra.mxu1 %v420_v39  ;;  %1138 = vmatprep.subr.bf16.mxu0 %v617_v40  ;;  %v505_v39 = vld [vmem:[#allocation2 + $0x2c8] sm:$0xff]  ;;  %v694_v40 = vld [vmem:[#allocation2 + $0x8b0] sm:$0xff] }
 0x2fc   :  { %1220 = vmatprep.subr.bf16.mxu1 %v427_v41  ;;  %1168 = vmatprep.mubr.bf16.mxu0 %v1888_v17  ;;  %v504_v41 = vld [vmem:[#allocation2 + $0x2c0] sm:$0xff] }
 0x2fd   :  { %1250 = vmatprep.mubr.bf16.mxu1 %v1865_v32  ;;  %v634_v32 = vld [vmem:[#allocation2 + $0x6d0] sm:$0xff] }
 0x2fe   :  { %1139 = vmatpush1.bf16.msra.mxu0 %v616_v42  ;;  %v701_v42 = vld [vmem:[#allocation2 + $0x8e8] sm:$0xff] }
 0x2ff   :  { %1221 = vmatpush1.bf16.msra.mxu1 %v426_v43  ;;  %1140 = vmatprep.subr.bf16.mxu0 %v623_v44  ;;  %v511_v43 = vld [vmem:[#allocation2 + $0x2f8] sm:$0xff]  ;;  %v700_v44 = vld [vmem:[#allocation2 + $0x8e0] sm:$0xff] }
 0x300   :  { %1222 = vmatprep.subr.bf16.mxu1 %v433_v47  ;;  %v510_v47 = vld [vmem:[#allocation2 + $0x2f0] sm:$0xff] }
 0x302   :  { %1141 = vmatpush1.bf16.msra.mxu0 %v622_v49  ;;  %v707_v49 = vld [vmem:[#allocation2 + $0x918] sm:$0xff] }
 0x303   :  { %1223 = vmatpush1.bf16.msra.mxu1 %v432_v50  ;;  %1142 = vmatprep.subr.bf16.mxu0 %v629_v51  ;;  %v517_v50 = vld [vmem:[#allocation2 + $0x328] sm:$0xff]  ;;  %v706_v51 = vld [vmem:[#allocation2 + $0x910] sm:$0xff] }
 0x304   :  { %1224 = vmatprep.subr.bf16.mxu1 %v439_v52  ;;  %v516_v52 = vld [vmem:[#allocation2 + $0x320] sm:$0xff] }
 0x306   :  { %1143 = vmatpush1.bf16.msra.mxu0 %v628_v53  ;;  %v713_v53 = vld [vmem:[#allocation2 + $0x948] sm:$0xff] }
 0x307   :  { %1225 = vmatpush1.bf16.msra.mxu1 %v438_v54  ;;  %1144 = vmatprep.subr.bf16.mxu0 %v635_v55  ;;  %v523_v54 = vld [vmem:[#allocation2 + $0x358] sm:$0xff]  ;;  %v712_v55 = vld [vmem:[#allocation2 + $0x940] sm:$0xff] }
 0x308   :  { %1226 = vmatprep.subr.bf16.mxu1 %v445_v56  ;;  %v522_v56 = vld [vmem:[#allocation2 + $0x350] sm:$0xff] }
 0x30a   :  { %1145 = vmatpush1.bf16.msra.mxu0 %v634_v32  ;;  %v719_v32 = vld [vmem:[#allocation2 + $0x978] sm:$0xff] }
 0x30b   :  { %1227 = vmatpush1.bf16.msra.mxu1 %v444_v57  ;;  %1146 = vmatprep.subr.bf16.mxu0 %v641_v58  ;;  %v529_v57 = vld [vmem:[#allocation2 + $0x388] sm:$0xff]  ;;  %v718_v58 = vld [vmem:[#allocation2 + $0x970] sm:$0xff] }
 0x30c   :  { %1228 = vmatprep.subr.bf16.mxu1 %v451_v59  ;;  %v528_v59 = vld [vmem:[#allocation2 + $0x380] sm:$0xff] }
 0x30e   :  { %1147 = vmatpush1.bf16.msra.mxu0 %v640_v60  ;;  %v725_v60 = vld [vmem:[#allocation2 + $0x9a8] sm:$0xff] }
 0x30f   :  { %1229 = vmatpush1.bf16.msra.mxu1 %v450_v61  ;;  %1148 = vmatprep.subr.bf16.mxu0 %v647_v62  ;;  %v724_v61 = vld [vmem:[#allocation2 + $0x9a0] sm:$0xff]  ;;  %v534_v62 = vld [vmem:[#allocation2 + $0x3b0] sm:$0xff] }
 0x310   :  { %1230 = vmatprep.subr.bf16.mxu1 %v457_v63  ;;  %v731_v63 = vld [vmem:[#allocation2 + $0x9d8] sm:$0xff] }
 0x312   :  { %1149 = vmatpush1.bf16.msra.mxu0 %v646_v0  ;;  %v541_v0 = vld [vmem:[#allocation2 + $0x3e8] sm:$0xff] }
 0x313   :  { %1231 = vmatpush1.bf16.msra.mxu1 %v456_v1  ;;  %1150 = vmatprep.subr.bf16.mxu0 %v653_v2  ;;  %v540_v1 = vld [vmem:[#allocation2 + $0x3e0] sm:$0xff]  ;;  %v737_v2 = vld [vmem:[#allocation2 + $0xa08] sm:$0xff] }
 0x314   :  { %1232 = vmatprep.subr.bf16.mxu1 %v463_v3  ;;  %v547_v3 = vld [vmem:[#allocation2 + $0x418] sm:$0xff] }
 0x316   :  { %1151 = vmatpush1.bf16.msra.mxu0 %v652_v4  ;;  %v736_v4 = vld [vmem:[#allocation2 + $0xa00] sm:$0xff] }
 0x317   :  { %1233 = vmatpush1.bf16.msra.mxu1 %v462_v5  ;;  %1152 = vmatprep.subr.bf16.mxu0 %v659_v7  ;;  %v546_v5 = vld [vmem:[#allocation2 + $0x410] sm:$0xff]  ;;  %v743_v7 = vld [vmem:[#allocation2 + $0xa38] sm:$0xff] }
 0x318   :  { %1234 = vmatprep.subr.bf16.mxu1 %v469_v8  ;;  %v553_v8 = vld [vmem:[#allocation2 + $0x448] sm:$0xff] }
 0x31a   :  { %1153 = vmatpush1.bf16.msra.mxu0 %v658_v9 }
 0x31b   :  { %1235 = vmatpush1.bf16.msra.mxu1 %v468_v10  ;;  %1154 = vmatprep.subr.bf16.mxu0 %v665_v11 }
 0x31c   :  { %1236 = vmatprep.subr.bf16.mxu1 %v475_v13  ;;  %v742_v13 = vld [vmem:[#allocation2 + $0xa30] sm:$0xff] }
 0x31e   :  { %1155 = vmatpush1.bf16.msra.mxu0 %v664_v14  ;;  %v552_v14 = vld [vmem:[#allocation2 + $0x440] sm:$0xff] }
 0x31f   :  { %1237 = vmatpush1.bf16.msra.mxu1 %v474_v15  ;;  %1156 = vmatprep.subr.bf16.mxu0 %v671_v16  ;;  %v749_v16 = vld [vmem:[#allocation2 + $0xa68] sm:$0xff] }
 0x320   :  { %1238 = vmatprep.subr.bf16.mxu1 %v481_v19  ;;  %v559_v19 = vld [vmem:[#allocation2 + $0x478] sm:$0xff] }
 0x322   :  { %1157 = vmatpush1.bf16.msra.mxu0 %v670_v20  ;;  %v748_v20 = vld [vmem:[#allocation2 + $0xa60] sm:$0xff] }
 0x323   :  { %1239 = vmatpush1.bf16.msra.mxu1 %v480_v21  ;;  %1158 = vmatprep.subr.bf16.mxu0 %v677_v22  ;;  %v558_v21 = vld [vmem:[#allocation2 + $0x470] sm:$0xff]  ;;  %v755_v22 = vld [vmem:[#allocation2 + $0xa98] sm:$0xff] }
 0x324   :  { %1240 = vmatprep.subr.bf16.mxu1 %v487_v18  ;;  %v565_v18 = vld [vmem:[#allocation2 + $0x4a8] sm:$0xff] }
 0x326   :  { %1159 = vmatpush1.bf16.msra.mxu0 %v676_v23  ;;  %v754_v23 = vld [vmem:[#allocation2 + $0xa90] sm:$0xff] }
 0x327   :  { %1241 = vmatpush1.bf16.msra.mxu1 %v486_v24  ;;  %1160 = vmatprep.subr.bf16.mxu0 %v683_v25  ;;  %v564_v24 = vld [vmem:[#allocation2 + $0x4a0] sm:$0xff]  ;;  %v761_v25 = vld [vmem:[#allocation2 + $0xac8] sm:$0xff] }
 0x328   :  { %1242 = vmatprep.subr.bf16.mxu1 %v493_v26  ;;  %v571_v26 = vld [vmem:[#allocation2 + $0x4d8] sm:$0xff] }
 0x32a   :  { %1161 = vmatpush1.bf16.msra.mxu0 %v682_v28  ;;  %v760_v28 = vld [vmem:[#allocation2 + $0xac0] sm:$0xff] }
 0x32b   :  { %1243 = vmatpush1.bf16.msra.mxu1 %v492_v29  ;;  %1162 = vmatprep.subr.bf16.mxu0 %v689_v30  ;;  %v570_v29 = vld [vmem:[#allocation2 + $0x4d0] sm:$0xff]  ;;  %v767_v30 = vld [vmem:[#allocation2 + $0xaf8] sm:$0xff] }
 0x32c   :  { %1244 = vmatprep.subr.bf16.mxu1 %v499_v31  ;;  %v577_v31 = vld [vmem:[#allocation2 + $0x508] sm:$0xff] }
 0x32e   :  { %1163 = vmatpush1.bf16.msra.mxu0 %v688_v33  ;;  %v766_v33 = vld [vmem:[#allocation2 + $0xaf0] sm:$0xff] }
 0x32f   :  { %1245 = vmatpush1.bf16.msra.mxu1 %v498_v34  ;;  %1164 = vmatprep.subr.bf16.mxu0 %v695_v37  ;;  %v576_v34 = vld [vmem:[#allocation2 + $0x500] sm:$0xff]  ;;  %v773_v37 = vld [vmem:[#allocation2 + $0xb28] sm:$0xff] }
 0x330   :  { %1246 = vmatprep.subr.bf16.mxu1 %v505_v39  ;;  %v583_v39 = vld [vmem:[#allocation2 + $0x538] sm:$0xff] }
 0x332   :  { %1165 = vmatpush1.bf16.msra.mxu0 %v694_v40  ;;  %v772_v40 = vld [vmem:[#allocation2 + $0xb20] sm:$0xff] }
 0x333   :  { %1247 = vmatpush1.bf16.msra.mxu1 %v504_v41  ;;  %1166 = vmatprep.subr.bf16.mxu0 %v701_v42  ;;  %v582_v41 = vld [vmem:[#allocation2 + $0x530] sm:$0xff]  ;;  %v779_v42 = vld [vmem:[#allocation2 + $0xb58] sm:$0xff] }
 0x334   :  { %1248 = vmatprep.subr.bf16.mxu1 %v511_v43  ;;  %v589_v43 = vld [vmem:[#allocation2 + $0x568] sm:$0xff] }
 0x336   :  { %1167 = vmatpush1.bf16.msra.mxu0 %v700_v44  ;;  %v778_v44 = vld [vmem:[#allocation2 + $0xb50] sm:$0xff] }
 0x337   :  { %1249 = vmatpush1.bf16.msra.mxu1 %v510_v47  ;;  %1177 = vmatprep.subr.bf16.mxu0 %v707_v49  ;;  %v588_v47 = vld [vmem:[#allocation2 + $0x560] sm:$0xff]  ;;  %v785_v49 = vld [vmem:[#allocation2 + $0xb88] sm:$0xff] }
 0x338   :  { %1259 = vmatprep.subr.bf16.mxu1 %v517_v50  ;;  %v595_v50 = vld [vmem:[#allocation2 + $0x598] sm:$0xff] }
 0x339   :  { %1169 = vmatmul.mubr.bf16.vlgmr.msra.gmra.mrb[12].mxu0 %v1869_v35 }
 0x33a   :  { %1251 = vmatmul.mubr.bf16.vlgmr.msra.gmra.mrb[4].mxu1 %v1879_v6  ;;  %1178 = vmatpush1.bf16.msra.mxu0 %v706_v51  ;;  %v535_v6 = vld [vmem:[#allocation2 + $0x3b8] sm:$0xff]  ;;  %v784_v51 = vld [vmem:[#allocation2 + $0xb80] sm:$0xff] }
 0x33b   :  { %1260 = vmatpush1.bf16.msra.mxu1 %v516_v52  ;;  %1179 = vmatprep.subr.bf16.mxu0 %v713_v53  ;;  %v594_v52 = vld [vmem:[#allocation2 + $0x590] sm:$0xff]  ;;  %v791_v53 = vld [vmem:[#allocation2 + $0xbb8] sm:$0xff] }
 0x33c   :  { %1261 = vmatprep.subr.bf16.mxu1 %v523_v54  ;;  %1209 = vmatprep.mubr.bf16.mxu0 %v1896_v27  ;;  %v601_v54 = vld [vmem:[#allocation2 + $0x5c8] sm:$0xff] }
 0x33d   :  { %1291 = vmatprep.mubr.bf16.mxu1 %v1874_v38  ;;  %v730_v38 = vld [vmem:[#allocation2 + $0x9d0] sm:$0xff] }
 0x33e   :  { %1180 = vmatpush1.bf16.msra.mxu0 %v712_v55  ;;  %v790_v55 = vld [vmem:[#allocation2 + $0xbb0] sm:$0xff] }
 0x33f   :  { %1262 = vmatpush1.bf16.msra.mxu1 %v522_v56  ;;  %1181 = vmatprep.subr.bf16.mxu0 %v719_v32  ;;  %v600_v56 = vld [vmem:[#allocation2 + $0x5c0] sm:$0xff]  ;;  %v797_v32 = vld [vmem:[#allocation2 + $0xbe8] sm:$0xff] }
 0x340   :  { %1263 = vmatprep.subr.bf16.mxu1 %v529_v57  ;;  %v607_v57 = vld [vmem:[#allocation2 + $0x5f8] sm:$0xff] }
 0x342   :  { %1182 = vmatpush1.bf16.msra.mxu0 %v718_v58  ;;  %v796_v58 = vld [vmem:[#allocation2 + $0xbe0] sm:$0xff] }
 0x343   :  { %1264 = vmatpush1.bf16.msra.mxu1 %v528_v59  ;;  %1183 = vmatprep.subr.bf16.mxu0 %v725_v60  ;;  %v606_v59 = vld [vmem:[#allocation2 + $0x5f0] sm:$0xff]  ;;  %v613_v60 = vld [vmem:[#allocation2 + $0x628] sm:$0xff] }
 0x344   :  { %1265 = vmatprep.subr.bf16.mxu1 %v535_v6  ;;  %v612_v6 = vld [vmem:[#allocation2 + $0x620] sm:$0xff] }
 0x346   :  { %1184 = vmatpush1.bf16.msra.mxu0 %v724_v61  ;;  %v619_v61 = vld [vmem:[#allocation2 + $0x658] sm:$0xff] }
 0x347   :  { %1266 = vmatpush1.bf16.msra.mxu1 %v534_v62  ;;  %1185 = vmatprep.subr.bf16.mxu0 %v731_v63  ;;  %v618_v62 = vld [vmem:[#allocation2 + $0x650] sm:$0xff]  ;;  %v625_v63 = vld [vmem:[#allocation2 + $0x688] sm:$0xff] }
 0x348   :  { %1267 = vmatprep.subr.bf16.mxu1 %v541_v0  ;;  %v624_v0 = vld [vmem:[#allocation2 + $0x680] sm:$0xff] }
 0x34a   :  { %1186 = vmatpush1.bf16.msra.mxu0 %v730_v38  ;;  %v631_v38 = vld [vmem:[#allocation2 + $0x6b8] sm:$0xff] }
 0x34b   :  { %1268 = vmatpush1.bf16.msra.mxu1 %v540_v1  ;;  %1187 = vmatprep.subr.bf16.mxu0 %v737_v2  ;;  %v630_v1 = vld [vmem:[#allocation2 + $0x6b0] sm:$0xff]  ;;  %v637_v2 = vld [vmem:[#allocation2 + $0x6e8] sm:$0xff] }
 0x34c   :  { %1269 = vmatprep.subr.bf16.mxu1 %v547_v3  ;;  %v1914_v9 = vpop.f32.mrb[8].mxu0  ;;  %v636_v3 = vld [vmem:[#allocation2 + $0x6e0] sm:$0xff] }
 0x34d   :  { %v1916_v10 = vpop.f32.mrb[9].mxu0 }
 0x34e   :  { %1188 = vmatpush1.bf16.msra.mxu0 %v736_v4  ;;  %v928_v11 = vpop.f32.mrb[10].mxu0  ;;  %v643_v4 = vld [vmem:[#allocation2 + $0x718] sm:$0xff] }
 0x34f   :  { %1270 = vmatpush1.bf16.msra.mxu1 %v546_v5  ;;  %1189 = vmatprep.subr.bf16.mxu0 %v743_v7  ;;  %v929_v15 = vpop.f32.mrb[11].mxu0  ;;  %v649_v5 = vld [vmem:[#allocation2 + $0x748] sm:$0xff]  ;;  %v655_v7 = vld [vmem:[#allocation2 + $0x778] sm:$0xff] }
 0x350   :  { %1271 = vmatprep.subr.bf16.mxu1 %v553_v8  ;;  %v654_v8 = vld [vmem:[#allocation2 + $0x770] sm:$0xff]  ;;  %v661_v11 = vld [vmem:[#allocation2 + $0x7a8] sm:$0xff] }
 0x351   :  { %v666_v15 = vld [vmem:[#allocation2 + $0x7d0] sm:$0xff] }
 0x352   :  { %1190 = vmatpush1.bf16.msra.mxu0 %v742_v13  ;;  %v660_v13 = vld [vmem:[#allocation2 + $0x7a0] sm:$0xff] }
 0x353   :  { %1272 = vmatpush1.bf16.msra.mxu1 %v552_v14  ;;  %1191 = vmatprep.subr.bf16.mxu0 %v749_v16  ;;  %v667_v14 = vld [vmem:[#allocation2 + $0x7d8] sm:$0xff]  ;;  %v673_v16 = vld [vmem:[#allocation2 + $0x808] sm:$0xff] }
 0x354   :  { %1273 = vmatprep.subr.bf16.mxu1 %v559_v19  ;;  %v672_v19 = vld [vmem:[#allocation2 + $0x800] sm:$0xff] }
 0x356   :  { %1192 = vmatpush1.bf16.msra.mxu0 %v748_v20  ;;  %v679_v20 = vld [vmem:[#allocation2 + $0x838] sm:$0xff] }
 0x357   :  { %1274 = vmatpush1.bf16.msra.mxu1 %v558_v21  ;;  %1193 = vmatprep.subr.bf16.mxu0 %v755_v22  ;;  %v678_v21 = vld [vmem:[#allocation2 + $0x830] sm:$0xff]  ;;  %v685_v22 = vld [vmem:[#allocation2 + $0x868] sm:$0xff] }
 0x358   :  { %1275 = vmatprep.subr.bf16.mxu1 %v565_v18  ;;  %v684_v18 = vld [vmem:[#allocation2 + $0x860] sm:$0xff] }
 0x35a   :  { %1194 = vmatpush1.bf16.msra.mxu0 %v754_v23  ;;  %v691_v23 = vld [vmem:[#allocation2 + $0x898] sm:$0xff] }
 0x35b   :  { %1276 = vmatpush1.bf16.msra.mxu1 %v564_v24  ;;  %1195 = vmatprep.subr.bf16.mxu0 %v761_v25  ;;  %v690_v24 = vld [vmem:[#allocation2 + $0x890] sm:$0xff]  ;;  %v697_v25 = vld [vmem:[#allocation2 + $0x8c8] sm:$0xff] }
 0x35c   :  { %1277 = vmatprep.subr.bf16.mxu1 %v571_v26  ;;  %v696_v26 = vld [vmem:[#allocation2 + $0x8c0] sm:$0xff] }
 0x35e   :  { %1196 = vmatpush1.bf16.msra.mxu0 %v760_v28  ;;  %v703_v28 = vld [vmem:[#allocation2 + $0x8f8] sm:$0xff] }
 0x35f   :  { %1278 = vmatpush1.bf16.msra.mxu1 %v570_v29  ;;  %1197 = vmatprep.subr.bf16.mxu0 %v767_v30  ;;  %v702_v29 = vld [vmem:[#allocation2 + $0x8f0] sm:$0xff]  ;;  %v709_v30 = vld [vmem:[#allocation2 + $0x928] sm:$0xff] }
 0x360   :  { %1279 = vmatprep.subr.bf16.mxu1 %v577_v31  ;;  %v708_v31 = vld [vmem:[#allocation2 + $0x920] sm:$0xff] }
 0x362   :  { %1198 = vmatpush1.bf16.msra.mxu0 %v766_v33  ;;  %v715_v33 = vld [vmem:[#allocation2 + $0x958] sm:$0xff] }
 0x363   :  { %1280 = vmatpush1.bf16.msra.mxu1 %v576_v34  ;;  %1199 = vmatprep.subr.bf16.mxu0 %v773_v37  ;;  %v714_v34 = vld [vmem:[#allocation2 + $0x950] sm:$0xff]  ;;  %v721_v37 = vld [vmem:[#allocation2 + $0x988] sm:$0xff] }
 0x364   :  { %1281 = vmatprep.subr.bf16.mxu1 %v583_v39  ;;  %v720_v39 = vld [vmem:[#allocation2 + $0x980] sm:$0xff] }
 0x366   :  { %1200 = vmatpush1.bf16.msra.mxu0 %v772_v40  ;;  %v727_v40 = vld [vmem:[#allocation2 + $0x9b8] sm:$0xff] }
 0x367   :  { %1282 = vmatpush1.bf16.msra.mxu1 %v582_v41  ;;  %1201 = vmatprep.subr.bf16.mxu0 %v779_v42  ;;  %v1923_v41 = vld [vmem:[#allocation9] sm:$0x3f]  ;;  %v726_v42 = vld [vmem:[#allocation2 + $0x9b0] sm:$0xff] }
 0x368   :  { %1283 = vmatprep.subr.bf16.mxu1 %v589_v43  ;;  %v733_v43 = vld [vmem:[#allocation2 + $0x9e8] sm:$0xff] }
 0x36a   :  { %1202 = vmatpush1.bf16.msra.mxu0 %v778_v44  ;;  %v809_v44 = vrot.slane %v1923_v41, %v353_v48  ;;  %v744_v48 = vld [vmem:[#allocation2 + $0xa40] sm:$0xff] }
 0x36b   :  { %1284 = vmatpush1.bf16.msra.mxu1 %v588_v47  ;;  %1203 = vmatprep.subr.bf16.mxu0 %v785_v49  ;;  %v739_v47 = vld [vmem:[#allocation2 + $0xa18] sm:$0xff] }
 0x36c   :  { %1285 = vmatprep.subr.bf16.mxu1 %v595_v50  ;;  %v738_v50 = vld [vmem:[#allocation2 + $0xa10] sm:$0xff] }
 0x36e   :  { %1204 = vmatpush1.bf16.msra.mxu0 %v784_v51  ;;  %v927_v51 = vadd.f32 %v1916_v10, %v809_v44  ;;  %v757_v10 = vld [vmem:[#allocation2 + $0xaa8] sm:$0xff] }
 0x36f   :  { %1286 = vmatpush1.bf16.msra.mxu1 %v594_v52  ;;  %1205 = vmatprep.subr.bf16.mxu0 %v791_v53  ;;  %v745_v53 = vld [vmem:[#allocation2 + $0xa48] sm:$0xff] }
 0x370   :  { %1287 = vmatprep.subr.bf16.mxu1 %v601_v54 }
 0x372   :  { %1206 = vmatpush1.bf16.msra.mxu0 %v790_v55 }
 0x373   :  { %1288 = vmatpush1.bf16.msra.mxu1 %v600_v56  ;;  %1207 = vmatprep.subr.bf16.mxu0 %v797_v32 }
 0x374   :  { %1289 = vmatprep.subr.bf16.mxu1 %v607_v57  ;;  %v751_v57 = vld [vmem:[#allocation2 + $0xa78] sm:$0xff] }
 0x376   :  { %1208 = vmatpush1.bf16.msra.mxu0 %v796_v58  ;;  %v750_v58 = vld [vmem:[#allocation2 + $0xa70] sm:$0xff] }
 0x377   :  { %1290 = vmatpush1.bf16.msra.mxu1 %v606_v59  ;;  %v756_v59 = vld [vmem:[#allocation2 + $0xaa0] sm:$0xff] }
 0x378   :  { %1300 = vmatprep.subr.bf16.mxu1 %v613_v60  ;;  %v763_v60 = vld [vmem:[#allocation2 + $0xad8] sm:$0xff] }
 0x379   :  { %1210 = vmatmul.mubr.bf16.vlgmr.msra.gmra.mrb[12].mxu0 %v1904_v36 }
 0x37a   :  { %1292 = vmatmul.mubr.bf16.vlgmr.msra.gmra.mrb[4].mxu1 %v1885_v12  ;;  %v642_v12 = vld [vmem:[#allocation2 + $0x710] sm:$0xff] }
 0x37b   :  { %1301 = vmatpush1.bf16.msra.mxu1 %v612_v6  ;;  %1332 = vmatprep.mubr.bf16.mxu1 %v1888_v17  ;;  %v648_v17 = vld [vmem:[#allocation2 + $0x740] sm:$0xff]  ;;  %v762_v6 = vld [vmem:[#allocation2 + $0xad0] sm:$0xff] }
 0x37c   :  { %1302 = vmatprep.subr.bf16.mxu1 %v619_v61  ;;  %v769_v61 = vld [vmem:[#allocation2 + $0xb08] sm:$0xff] }
 0x37f   :  { %1303 = vmatpush1.bf16.msra.mxu1 %v618_v62  ;;  %v768_v62 = vld [vmem:[#allocation2 + $0xb00] sm:$0xff] }
 0x380   :  { %1304 = vmatprep.subr.bf16.mxu1 %v625_v63  ;;  %v775_v63 = vld [vmem:[#allocation2 + $0xb38] sm:$0xff] }
 0x383   :  { %1305 = vmatpush1.bf16.msra.mxu1 %v624_v0  ;;  %v774_v0 = vld [vmem:[#allocation2 + $0xb30] sm:$0xff] }
 0x384   :  { %1306 = vmatprep.subr.bf16.mxu1 %v631_v38  ;;  %v781_v38 = vld [vmem:[#allocation2 + $0xb68] sm:$0xff] }
 0x387   :  { %1307 = vmatpush1.bf16.msra.mxu1 %v630_v1  ;;  %v780_v1 = vld [vmem:[#allocation2 + $0xb60] sm:$0xff] }
 0x388   :  { %1308 = vmatprep.subr.bf16.mxu1 %v637_v2  ;;  %v787_v2 = vld [vmem:[#allocation2 + $0xb98] sm:$0xff] }
 0x38b   :  { %1309 = vmatpush1.bf16.msra.mxu1 %v636_v3  ;;  %v786_v3 = vld [vmem:[#allocation2 + $0xb90] sm:$0xff] }
 0x38c   :  { %1310 = vmatprep.subr.bf16.mxu1 %v643_v4  ;;  %v793_v4 = vld [vmem:[#allocation2 + $0xbc8] sm:$0xff] }
 0x38f   :  { %1311 = vmatpush1.bf16.msra.mxu1 %v642_v12  ;;  %v792_v12 = vld [vmem:[#allocation2 + $0xbc0] sm:$0xff] }
 0x390   :  { %1312 = vmatprep.subr.bf16.mxu1 %v649_v5  ;;  %v799_v5 = vld [vmem:[#allocation2 + $0xbf8] sm:$0xff] }
 0x393   :  { %1313 = vmatpush1.bf16.msra.mxu1 %v648_v17  ;;  %v798_v17 = vld [vmem:[#allocation2 + $0xbf0] sm:$0xff] }
 0x394   :  { %1314 = vmatprep.subr.bf16.mxu1 %v655_v7  ;;  %v812_v7 = vsub.s32 2, %v1842_v45 }
 0x397   :  { %1315 = vmatpush1.bf16.msra.mxu1 %v654_v8  ;;  %v1739_v8 = vmov 1983009808  }
 0x398   :  { %1316 = vmatprep.subr.bf16.mxu1 %v661_v11  ;;  %v1391_v11 = vunpack.c.l.s4 %v1739_v8 }
 0x39b   :  { %1317 = vmatpush1.bf16.msra.mxu1 %v660_v13  ;;  %v816_v13 = vsub.s32 3, %v1842_v45 }
 0x39c   :  { %1318 = vmatprep.subr.bf16.mxu1 %v667_v14  ;;  %v813_v14 = vrot.slane %v1923_v41, %v812_v7 }
 0x39f   :  { %1319 = vmatpush1.bf16.msra.mxu1 %v666_v15  ;;  %v1392_v15 = vunpack.c.0.s8 %v1391_v11 }
 0x3a0   :  { %1320 = vmatprep.subr.bf16.mxu1 %v673_v16  ;;  %v817_v16 = vrot.slane %v1923_v41, %v816_v13 }
 0x3a3   :  { %1321 = vmatpush1.bf16.msra.mxu1 %v672_v19 }
 0x3a4   :  { %1322 = vmatprep.subr.bf16.mxu1 %v679_v20 }
 0x3a7   :  { %1323 = vmatpush1.bf16.msra.mxu1 %v678_v21 }
 0x3a8   :  { %1324 = vmatprep.subr.bf16.mxu1 %v685_v22  ;;  %v1395_v22 = vsub.s32 %v1392_v15, %v1842_v45 }
 0x3ab   :  { %1325 = vmatpush1.bf16.msra.mxu1 %v684_v18 }
 0x3ac   :  { %1326 = vmatprep.subr.bf16.mxu1 %v691_v23 }
 0x3af   :  { %1327 = vmatpush1.bf16.msra.mxu1 %v690_v24 }
 0x3b0   :  { %1328 = vmatprep.subr.bf16.mxu1 %v697_v25 }
 0x3b3   :  { %1329 = vmatpush1.bf16.msra.mxu1 %v696_v26 }
 0x3b4   :  { %1330 = vmatprep.subr.bf16.mxu1 %v703_v28 }
 0x3b7   :  { %1331 = vmatpush1.bf16.msra.mxu1 %v702_v29 }
 0x3b8   :  { %1341 = vmatprep.subr.bf16.mxu1 %v709_v30 }
 0x3ba   :  { %1333 = vmatmul.mubr.bf16.vlgmr.msra.gmra.mrb[4].mxu1 %v1869_v35  ;;  %v805_v35 = vrot.slane %v1923_v41, %v349_v46 }
 0x3bb   :  { %1342 = vmatpush1.bf16.msra.mxu1 %v708_v31  ;;  %1373 = vmatprep.mubr.bf16.mxu1 %v1896_v27  ;;  %v732_v27 = vld [vmem:[#allocation2 + $0x9e0] sm:$0xff] }
 0x3bc   :  { %1343 = vmatprep.subr.bf16.mxu1 %v715_v33  ;;  %v925_v49 = vadd.f32 %v1914_v9, %v805_v35 }
 0x3bf   :  { %1344 = vmatpush1.bf16.msra.mxu1 %v714_v34 }
 0x3c0   :  { %1345 = vmatprep.subr.bf16.mxu1 %v721_v37 }
 0x3c3   :  { %1346 = vmatpush1.bf16.msra.mxu1 %v720_v39 }
 0x3c4   :  { %1347 = vmatprep.subr.bf16.mxu1 %v727_v40 }
 0x3c7   :  { %1348 = vmatpush1.bf16.msra.mxu1 %v726_v42 }
 0x3c8   :  { %1349 = vmatprep.subr.bf16.mxu1 %v733_v43 }
 0x3cb   :  { %1350 = vmatpush1.bf16.msra.mxu1 %v732_v27 }
 0x3cc   :  { %1351 = vmatprep.subr.bf16.mxu1 %v739_v47 }
 0x3cd   :  { %v1047_v52 = vpop.f32.mrb[0].mxu1 }
 0x3ce   :  { %v1933_v54 = vadd.f32 %v1047_v52, %v925_v49  ;;  %v1049_v46 = vpop.f32.mrb[1].mxu1 }
 0x3cf   :  { %v1935_v55 = vadd.f32 %v1049_v46, %v927_v51  ;;  %v1051_v56 = vpop.f32.mrb[2].mxu1  ;;  %1352 = vmatpush1.bf16.msra.mxu1 %v738_v50 }
 0x3d0   :  { %v1052_v32 = vpop.f32.mrb[3].mxu1  ;;  %1353 = vmatprep.subr.bf16.mxu1 %v745_v53 }
 0x3d1   :  { %v1388_v9 = vcombine.low %v1933_v54, %v1935_v55 }
 0x3d3   :  { %1354 = vmatpush1.bf16.msra.mxu1 %v744_v48  ;;  %v1396_v25 = vrot.slane %v1388_v9, %v1395_v22 }
 0x3d4   :  { %1355 = vmatprep.subr.bf16.mxu1 %v751_v57 }
 0x3d7   :  { %1356 = vmatpush1.bf16.msra.mxu1 %v750_v58 }
 0x3d8   :  { %1357 = vmatprep.subr.bf16.mxu1 %v757_v10 }
 0x3db   :  { %1358 = vmatpush1.bf16.msra.mxu1 %v756_v59 }
 0x3dc   :  { %1359 = vmatprep.subr.bf16.mxu1 %v763_v60 }
 0x3df   :  { %1360 = vmatpush1.bf16.msra.mxu1 %v762_v6 }
 0x3e0   :  { %1361 = vmatprep.subr.bf16.mxu1 %v769_v61 }
 0x3e3   :  { %1362 = vmatpush1.bf16.msra.mxu1 %v768_v62 }
 0x3e4   :  { %1363 = vmatprep.subr.bf16.mxu1 %v775_v63 }
 0x3e7   :  { %1364 = vmatpush1.bf16.msra.mxu1 %v774_v0 }
 0x3e8   :  { %1365 = vmatprep.subr.bf16.mxu1 %v781_v38 }
 0x3eb   :  { %1366 = vmatpush1.bf16.msra.mxu1 %v780_v1 }
 0x3ec   :  { %1367 = vmatprep.subr.bf16.mxu1 %v787_v2 }
 0x3ef   :  { %1368 = vmatpush1.bf16.msra.mxu1 %v786_v3 }
 0x3f0   :  { %1369 = vmatprep.subr.bf16.mxu1 %v793_v4 }
 0x3f3   :  { %1370 = vmatpush1.bf16.msra.mxu1 %v792_v12 }
 0x3f4   :  { %1371 = vmatprep.subr.bf16.mxu1 %v799_v5 }
 0x3f7   :  { %1372 = vmatpush1.bf16.msra.mxu1 %v798_v17 }
 0x3fa   :  { %1374 = vmatmul.mubr.bf16.vlgmr.msra.gmra.mrb[4].mxu1 %v1904_v36 }
 0x44c   :  { %v1211_v19 = vpop.f32.mrb[12].mxu0 }
 0x44d   :  { %v1497_v20 = vadd.f32 %v1211_v19, %v813_v14  ;;  %v1213_v21 = vpop.f32.mrb[13].mxu0 }
 0x44e   :  { %v1498_v18 = vadd.f32 %v1213_v21, %v817_v16  ;;  %v1215_v23 = vpop.f32.mrb[14].mxu0 }
 0x44f   :  { %v1216_v24 = vpop.f32.mrb[15].mxu0 }
 0x450   :  { %v1389_v36 = vcombine.low %v1497_v20, %v1498_v18 }
 0x452   :  { %v1403_v26 = vrot.slane %v1389_v36, %v1395_v22 }
 0x453   :  { %1680 = shalt.err (!%p1677_p0)
}
 0x454   :  { %s1681_s18 = scalar_lea.hbm %s1980_s7, 256 }
 0x455   :  { %p1682_p1 = scmp.ne.s32.totalorder %s1980_s7, %s1681_s18  ;;  %p1685_p2 = scmp.lt.u32.totalorder %s1681_s18, %s1980_s7 }
 0x457   :  { %p1687_p3 = pnand %p1685_p2, %p1682_p1 }
 0x459   :  { %1690 = shalt.err (!%p1687_p3)
}
 0x45a   :  { %1426 = dma.vmem_to_hbm [thread:$0]  %s1424_s14, 256, %s1980_s7, [#allocation6]   ;;  %v1404_v28 = vcombine.low %v1396_v25, %v1403_v26  ;;  %v820_v29 = vsub.s32 4, %v1842_v45  ;;  %v824_v30 = vsub.s32 5, %v1842_v45 }
 0x45b   :  { %s1741_s23 = smov [#allocation11]  }
 0x45c   :  { %1415 = vst [vmem:[#allocation11] sm:$0xff] %v1404_v28  ;;  %v821_v31 = vrot.slane %v1923_v41, %v820_v29  ;;  %v825_v33 = vrot.slane %v1923_v41, %v824_v30  ;;  %s1433_s24 = sshll.u32 %s1741_s23, 4  ;;  %s1434_s24 = int_to_ptr.vmem [resolvable:$true] %s1433_s24 }
 0x45d   :  { %s1691_s7 = scalar_lea.vmem %s1434_s24, 192  ;;  %p1696_p5 = scmp.lt.s32.totalorder %s1434_s24, %s1434_s24 }
 0x45e   :  { %p1692_p4 = scmp.ne.s32.totalorder %s1434_s24, %s1691_s7  ;;  %p1697_p6 = scmp.lt.s32.totalorder %s1691_s7, %s1691_s7 }
 0x460   :  { %p1698_p7 = por %p1697_p6, %p1696_p5 }
 0x462   :  { %p1699_p8 = pnand %p1698_p7, %p1692_p4 }
 0x4cd   :  { %v1375_v34 = vpop.f32.mrb[4].mxu1 }
 0x4ce   :  { %v1499_v37 = vadd.f32 %v1375_v34, %v821_v31  ;;  %v1377_v39 = vpop.f32.mrb[5].mxu1 }
 0x4cf   :  { %v1500_v40 = vadd.f32 %v1377_v39, %v825_v33  ;;  %v1379_v42 = vpop.f32.mrb[6].mxu1 }
 0x4d0   :  { %v1380_v43 = vpop.f32.mrb[7].mxu1 }
 0x4d1   :  { %v1405_v35 = vcombine.low %v1499_v37, %v1500_v40 }
 0x4d3   :  { %1491 = vst.sshfl [vmem:[#allocation11 + $0x8] sm:$0x33 pattern:$0x76325410] %v1405_v35 }
 0x4d4   :  { %1702 = shalt.err (!%p1699_p8)
}
 0x4d5   :  { %s1703_s26 = scalar_lea.hbm %s1981_s8, 192 }
 0x4d6   :  { %p1704_p9 = scmp.ne.s32.totalorder %s1981_s8, %s1703_s26  ;;  %p1707_p10 = scmp.lt.u32.totalorder %s1703_s26, %s1981_s8 }
 0x4d8   :  { %p1709_p11 = pnand %p1707_p10, %p1704_p9 }
 0x4da   :  { %1712 = shalt.err (!%p1709_p11)
}
 0x4db   :  { %1436 = dma.vmem_to_hbm [thread:$0]  %s1434_s24, 192, %s1981_s8, [#allocation12]  }
 0x4dc   :  { %1719 = dma.done.wait [#allocation6], 256  }
 0x4dd   :  { %1720 = vsyncadd [#allocation6], 4294967040 }
 0x4de   :  { %1721 = dma.done.wait [#allocation12], 192  }
 0x4df   :  { %1722 = vsyncadd [#allocation12], 4294967104 }
 0x4e0   :  { %1443 = vsyncpa [#allocation5], 1 }
 0x4e1   :  { %1444 = vsyncpa [#allocation8], 1 }
 0x4e2   :  { %1445 = vsyncpa [#allocation6], 1 }
 0x4e3   :  { %1446 = vsyncpa [#allocation12], 1 }
 0x4e4   :  { %1447 = vsyncmov [#allocation3] }
 0x4e7   :  { %s1448_s5 = vpop.sfrf %1447 }
 0x4e8   :  { %p1492_p12 = scmp.ne.s32.totalorder %s1448_s5, 0 }
 0x4ea   :  { %1452 = shalt.err (%p1492_p12)  }

</bundles_post_ra>
